<compile_context>
chip_gen: v7x
topology: tpu7x:2x2x1
jax: 0.10.0
libtpu: 0.0.40
codegen_flags: <defaults>
</compile_context>

<pallas_src>
import functools

import jax
import jax.numpy as jnp
from jax.experimental import pallas as pl
from jax.experimental.pallas import tpu as pltpu


def _attention_block_kernel(
    x_ref,       # (1, C, HWP) full (padded) sample, lane-dense HW-last
    gamma_ref,   # (C, 1)   GroupNorm scale
    beta_ref,    # (C, 1)   GroupNorm shift
    ohgc_ref,    # (G, C)   group <- channel one-hot
    ohcg_ref,    # (C, G)   channel <- group one-hot
    wqkv_ref,    # (3C, C)  fused QKV weight, compute_dtype, softmax scale folded in q rows
    bqkv_ref,    # (3C, 1)  f32, softmax scale folded in q rows
    wo_ref,      # (C, C)   compute_dtype
    bo_ref,      # (C, 1)   f32
    o_ref,       # (1, C, TQ) output query tile
    q_sc,        # scratch (C, HWP) compute_dtype (pre-scaled q)
    k_sc,        # scratch (C, HWP) compute_dtype (no transpose)
    v_sc,        # scratch (C, HWP) compute_dtype
    *,
    eps: float,
    kv_tile: int,
    hw_valid: int,
    compute_dtype,
):
    qi = pl.program_id(1)
    c = wo_ref.shape[0]
    hwp = x_ref.shape[2]
    tq = o_ref.shape[2]
    tk = kv_tile
    num_kv = hwp // tk
    is_bf16 = jnp.dtype(compute_dtype) == jnp.dtype(jnp.bfloat16)
    masked = hw_valid != hwp  # static: padding present?

    # ------------- once per sample (q-tile 0): GroupNorm + fused QKV -> scratch -------------
    @pl.when(qi == 0)
    def _():
        # GroupNorm statistics, chunked over HW, accumulated in f32.
        s1 = jnp.zeros((c, 1), jnp.float32)
        s2 = jnp.zeros((c, 1), jnp.float32)
        for j in range(num_kv):  # static chunk loop
            xc = x_ref[0, :, pl.ds(j * tk, tk)].astype(jnp.float32)
            s1 = s1 + jnp.sum(xc, axis=1, keepdims=True)
            s2 = s2 + jnp.sum(xc * xc, axis=1, keepdims=True)
        g = ohgc_ref.shape[0]
        denom = jnp.float32(hw_valid * (c // g))  # true (unpadded) element count
        gmean = jnp.dot(ohgc_ref[...], s1, preferred_element_type=jnp.float32) / denom
        gex2 = jnp.dot(ohgc_ref[...], s2, preferred_element_type=jnp.float32) / denom
        # clamp: single-pass E[x^2]-mean^2 can round slightly negative
        gvar = jnp.maximum(gex2 - gmean * gmean, 0.0)
        ginv = jax.lax.rsqrt(gvar + eps)
        mean_c = jnp.dot(ohcg_ref[...], gmean, preferred_element_type=jnp.float32)  # (C,1)
        inv_c = jnp.dot(ohcg_ref[...], ginv, preferred_element_type=jnp.float32)    # (C,1)
        scale_c = inv_c * gamma_ref[...]
        shift_c = beta_ref[...] - mean_c * scale_c

        # Fused QKV projection, chunked over HW, written directly into scratch
        # (bounds the transient to (3C, TK); softmax scale already folded into weights).
        wqkv = wqkv_ref[...]
        bqkv = bqkv_ref[...]
        for j in range(num_kv):  # static chunk loop
            sl = pl.ds(j * tk, tk)
            xc = x_ref[0, :, sl].astype(jnp.float32)
            xn = (xc * scale_c + shift_c).astype(compute_dtype)
            qkv = jnp.dot(wqkv, xn, preferred_element_type=jnp.float32) + bqkv  # (3C, TK)
            q_sc[:, sl] = qkv[0:c].astype(compute_dtype)
            k_sc[:, sl] = qkv[c:2 * c].astype(compute_dtype)
            v_sc[:, sl] = qkv[2 * c:3 * c].astype(compute_dtype)

    # ------------- per query tile: flash-style online-softmax attention -------------
    q_start = pl.multiple_of(qi * tq, tq)
    qt = q_sc[:, pl.ds(q_start, tq)]  # (C, TQ) compute_dtype, already scaled by C**-0.5

    def kv_step(j, carry):
        m_prev, l_prev, acc_prev = carry
        k_start = pl.multiple_of(j * tk, tk)
        kc = k_sc[:, pl.ds(k_start, tk)]  # (C, TK)
        vc = v_sc[:, pl.ds(k_start, tk)]  # (C, TK)
        # Contract the channel (sublane) axis of both operands -> (TK, TQ); no K transpose.
        s = jax.lax.dot_general(kc, qt, dimension_numbers=(((0,), (0,)), ((), ())),
                                preferred_element_type=jnp.float32)
        if masked:  # static: only emitted when HW was padded
            key_idx = k_start + jax.lax.broadcasted_iota(jnp.int32, (tk, 1), 0)
            s = jnp.where(key_idx < hw_valid, s, jnp.float32(-1e30))
        m_new = jnp.maximum(m_prev, jnp.max(s, axis=0, keepdims=True))  # (1, TQ)
        alpha = jnp.exp(m_prev - m_new)
        sm = s - m_new
        # bf16 exp on v6e/v7x (p feeds a bf16 matmul anyway); f32 on v5e / f32 runs.
        p = jnp.exp(sm.astype(jnp.bfloat16)) if is_bf16 else jnp.exp(sm)  # (TK, TQ)
        l_new = alpha * l_prev + jnp.sum(p, axis=0, keepdims=True, dtype=jnp.float32)
        acc_new = alpha * acc_prev + jnp.dot(vc, p.astype(compute_dtype),
                                             preferred_element_type=jnp.float32)  # (C, TQ)
        return m_new, l_new, acc_new

    m0 = jnp.full((1, tq), -jnp.inf, jnp.float32)
    l0 = jnp.zeros((1, tq), jnp.float32)
    acc0 = jnp.zeros((c, tq), jnp.float32)
    _, l_f, acc_f = jax.lax.fori_loop(0, num_kv, kv_step, (m0, l0, acc0),
                                      unroll=min(4, num_kv))

    # Exact division (the approx EUP reciprocal previously blew the 2e-3 tolerance).
    out = acc_f / l_f  # (C, TQ) f32

    # ------------- 1x1 output conv + residual -------------
    y = jnp.dot(wo_ref[...], out.astype(compute_dtype),
                preferred_element_type=jnp.float32) + bo_ref[...]
    y = y + x_ref[0, :, pl.ds(q_start, tq)].astype(jnp.float32)
    o_ref[0] = y.astype(o_ref.dtype)


def attention_block(x_nchw, params, *, num_groups, eps=1e-5,
                    q_tile=128, kv_tile=128, compute_dtype=jnp.float32):
    """x_nchw: (N, C, H, W) -> (N, C, H, W). Params use conv (out, in) convention.

    Generation tuning: v6e/v7x -> compute_dtype=jnp.bfloat16, q_tile=kv_tile=256
    (VMEM permitting; on v7x prefer kv_tile=256, q_tile=128 if tight);
    v5e -> compute_dtype=jnp.bfloat16, 128-wide tiles (MXU is 128x128).
    """
    n, c, h, w = x_nchw.shape
    hw = h * w
    assert c % num_groups == 0
    x_tok = x_nchw.reshape(n, c, hw)  # free reshape: NCHW flattens H*W contiguously

    # Lane-align HW to a multiple of 128: unmasked stores, aligned MXU panels.
    hw_pad = ((hw + 127) // 128) * 128
    if hw_pad != hw:
        x_tok = jnp.pad(x_tok, ((0, 0), (0, 0), (0, hw_pad - hw)))

    tq = q_tile if hw_pad % q_tile == 0 else 128
    tk = kv_tile if hw_pad % kv_tile == 0 else 128
    num_q = hw_pad // tq

    gamma, beta, wq, bq, wk, bk, wv, bv, wo, bo = params

    # Host-side: fold the C**-0.5 softmax scale into the q projection, cast weights
    # to compute_dtype once (halves weight bytes in VMEM / over DMA for bf16).
    attn_scale = float(c) ** -0.5
    w_qkv = jnp.concatenate([wq * attn_scale, wk, wv], axis=0).astype(compute_dtype)
    b_qkv = jnp.concatenate([bq * attn_scale, bk, bv], axis=0).reshape(3 * c, 1)
    b_qkv = b_qkv.astype(jnp.float32)
    wo_c = wo.astype(compute_dtype)
    bo_col = bo.reshape(c, 1).astype(jnp.float32)
    gamma_col = gamma.reshape(c, 1).astype(jnp.float32)
    beta_col = beta.reshape(c, 1).astype(jnp.float32)

    # channel<->group one-hot maps for GroupNorm reductions (tiny, precomputed)
    ch = jnp.arange(c, dtype=jnp.int32)
    grp = jnp.arange(num_groups, dtype=jnp.int32)
    oh_cg = (ch[:, None] // (c // num_groups) == grp[None, :]).astype(jnp.float32)  # (C, G)
    oh_gc = oh_cg.T                                                                  # (G, C)

    kernel = functools.partial(_attention_block_kernel, eps=eps, kv_tile=tk,
                               hw_valid=hw, compute_dtype=compute_dtype)
    const2d = lambda shape: pl.BlockSpec(shape, lambda b, q: (0, 0))

    # ---- VMEM budget: scratch + double-buffered blocks + in-kernel transients ----
    cbytes = jnp.dtype(compute_dtype).itemsize
    xbytes = jnp.dtype(x_nchw.dtype).itemsize
    budget = (
        3 * c * hw_pad * cbytes                                   # q/k/v scratch
        + 2 * c * hw_pad * xbytes                                 # x block (double-buffered)
        + 2 * c * tq * xbytes                                     # out block (double-buffered)
        + 2 * (4 * c * c * cbytes + (7 * c + 2 * c * num_groups) * 4)  # weights / consts
        + (4 * c + 3 * c) * tk * 4                                # prologue chunk transients
        + (2 * tk * tq + 4 * c * tq) * 4                          # kv-loop transients
    )
    try:
        vmem_cap = int(pltpu.get_tpu_info().vmem_capacity_bytes)  # per-generation capacity
    except Exception:
        vmem_cap = 64 * 1024 * 1024
    headroom = 16 * 1024 * 1024
    vmem_limit = int(min(max(vmem_cap - headroom, 32 * 1024 * 1024),
                         max(32 * 1024 * 1024, 2 * budget)))

    out_tok = pl.pallas_call(
        kernel,
        out_shape=jax.ShapeDtypeStruct((n, c, hw_pad), x_nchw.dtype),
        grid_spec=pltpu.PrefetchScalarGridSpec(
            num_scalar_prefetch=0,
            grid=(n, num_q),
            in_specs=[
                # TODO(synk): for very large C*HW on v7x, move this full-sample block to
                # memory_space=pl.ANY with a chunked manual DMA inside the qi==0 prologue
                # (plus a separate (1,C,TQ) residual tile) to drop the double-buffered
                # whole-sample copy from VMEM.
                pl.BlockSpec((1, c, hw_pad), lambda b, q: (b, 0, 0)),   # x (full sample)
                const2d((c, 1)),                                        # gamma
                const2d((c, 1)),                                        # beta
                const2d((num_groups, c)),                               # one-hot (G, C)
                const2d((c, num_groups)),                               # one-hot (C, G)
                const2d((3 * c, c)),                                    # fused QKV weight
                const2d((3 * c, 1)),                                    # fused QKV bias
                const2d((c, c)),                                        # out-proj weight
                const2d((c, 1)),                                        # out-proj bias
            ],
            out_specs=pl.BlockSpec((1, c, tq), lambda b, q: (b, 0, q)),
            scratch_shapes=[
                pltpu.VMEM((c, hw_pad), compute_dtype),   # q (softmax scale pre-folded)
                pltpu.VMEM((c, hw_pad), compute_dtype),   # k (kept (C,HW): no transpose)
                pltpu.VMEM((c, hw_pad), compute_dtype),   # v
            ],
        ),
        compiler_params=pltpu.CompilerParams(
            # TODO(synk): q-axis could also be 'parallel' (v7x megacore) by hoisting the
            # GroupNorm+QKV prologue into its own pallas_call producing q/k/v in HBM.
            dimension_semantics=("parallel", "arbitrary"),
            vmem_limit_bytes=vmem_limit),
    )(x_tok, gamma_col, beta_col, oh_gc, oh_cg, w_qkv, b_qkv, wo_c, bo_col)

    if hw_pad != hw:
        out_tok = out_tok[:, :, :hw]
    return out_tok.reshape(n, c, h, w)


def _reference(x_nchw, params, *, num_groups, eps=1e-5):
    """Pure-JAX reference matching the PyTorch forward pass (norm='gn')."""
    gamma, beta, wq, bq, wk, bk, wv, bv, wo, bo = params
    n, c, h, w = x_nchw.shape
    hw = h * w
    xg = x_nchw.reshape(n, num_groups, c // num_groups, h, w)
    mean = xg.mean(axis=(2, 3, 4), keepdims=True)
    var = xg.var(axis=(2, 3, 4), keepdims=True)
    xn = ((xg - mean) / jnp.sqrt(var + eps)).reshape(n, c, h, w)
    xn = xn * gamma.reshape(1, c, 1, 1) + beta.reshape(1, c, 1, 1)
    t = xn.reshape(n, c, hw)                                          # (N, C, HW)
    q = jnp.einsum("oc,nch->noh", wq, t) + bq.reshape(1, c, 1)
    k = jnp.einsum("oc,nch->noh", wk, t) + bk.reshape(1, c, 1)
    v = jnp.einsum("oc,nch->noh", wv, t) + bv.reshape(1, c, 1)
    scores = jnp.einsum("nci,ncj->nij", q, k) * (c ** -0.5)           # (N, HW, HW)
    attn = jax.nn.softmax(scores, axis=-1)
    out = jnp.einsum("nij,ncj->nci", attn, v)                         # (N, C, HW)
    y = jnp.einsum("oc,nch->noh", wo, out) + bo.reshape(1, c, 1)
    return y.reshape(n, c, h, w) + x_nchw


def init_params(key, c):
    ks = jax.random.split(key, 8)
    sc = 1.0 / (c ** 0.5)
    gamma = jnp.ones((c,), jnp.float32)
    beta = jnp.zeros((c,), jnp.float32)
    wq = jax.random.normal(ks[0], (c, c), jnp.float32) * sc
    wk = jax.random.normal(ks[1], (c, c), jnp.float32) * sc
    wv = jax.random.normal(ks[2], (c, c), jnp.float32) * sc
    wo = jax.random.normal(ks[3], (c, c), jnp.float32) * sc
    bq = jax.random.normal(ks[4], (c,), jnp.float32) * 0.1
    bk = jax.random.normal(ks[5], (c,), jnp.float32) * 0.1
    bv = jax.random.normal(ks[6], (c,), jnp.float32) * 0.1
    bo = jax.random.normal(ks[7], (c,), jnp.float32) * 0.1
    return (gamma, beta, wq, bq, wk, bk, wv, bv, wo, bo)


if __name__ == "__main__":
    key = jax.random.PRNGKey(0)
    kx, kp = jax.random.split(key)

    N, C, H, W = 2, 8, 16, 16          # HW = 256 tokens -> 2 q-tiles x 2 kv-tiles of 128
    NUM_GROUPS = 4                      # must divide C

    x = jax.random.normal(kx, (N, C, H, W), jnp.float32)
    params = init_params(kp, C)

    y = attention_block(x, params, num_groups=NUM_GROUPS)   # f32 run for tight ref match
    y = jax.block_until_ready(y)

    y_ref = jax.block_until_ready(_reference(x, params, num_groups=NUM_GROUPS))
    assert y.shape == (N, C, H, W)
    err = float(jnp.max(jnp.abs(y - y_ref)))
    assert jnp.allclose(y, y_ref, atol=2e-3, rtol=2e-3), f"mismatch vs reference, max abs err={err}"

    print("KERNEL_OK")
</pallas_src>

<mosaic_0001>
module attributes {stable_mosaic.version = 11 : i64} {
  func.func @_attention_block_kernel(%arg0: i32, %arg1: i32, %arg2: memref<1x8x256xf32, #tpu.memory_space<vmem>>, %arg3: memref<8x1xf32, #tpu.memory_space<vmem>>, %arg4: memref<8x1xf32, #tpu.memory_space<vmem>>, %arg5: memref<4x8xf32, #tpu.memory_space<vmem>>, %arg6: memref<8x4xf32, #tpu.memory_space<vmem>>, %arg7: memref<24x8xf32, #tpu.memory_space<vmem>>, %arg8: memref<24x1xf32, #tpu.memory_space<vmem>>, %arg9: memref<8x8xf32, #tpu.memory_space<vmem>>, %arg10: memref<8x1xf32, #tpu.memory_space<vmem>>, %arg11: memref<1x8x128xf32, #tpu.memory_space<vmem>>, %arg12: memref<8x256xf32, #tpu.memory_space<vmem>>, %arg13: memref<8x256xf32, #tpu.memory_space<vmem>>, %arg14: memref<8x256xf32, #tpu.memory_space<vmem>>) attributes {dimension_semantics = [#tpu.dimension_semantics<parallel>, #tpu.dimension_semantics<arbitrary>], iteration_bounds = array<i64: 2, 2>, scalar_prefetch = 0 : i64, scratch_operands = 3 : i64, tpu.core_type = #tpu.core_type<tc>, window_params = [{transform_indices = @transform_0, window_bounds = array<i64: 1, 8, 256>}, {pipeline_mode = #tpu.pipeline_mode<synchronous>, transform_indices = @transform_1, window_bounds = array<i64: 8, 1>}, {pipeline_mode = #tpu.pipeline_mode<synchronous>, transform_indices = @transform_2, window_bounds = array<i64: 8, 1>}, {pipeline_mode = #tpu.pipeline_mode<synchronous>, transform_indices = @transform_3, window_bounds = array<i64: 4, 8>}, {pipeline_mode = #tpu.pipeline_mode<synchronous>, transform_indices = @transform_4, window_bounds = array<i64: 8, 4>}, {pipeline_mode = #tpu.pipeline_mode<synchronous>, transform_indices = @transform_5, window_bounds = array<i64: 24, 8>}, {pipeline_mode = #tpu.pipeline_mode<synchronous>, transform_indices = @transform_6, window_bounds = array<i64: 24, 1>}, {pipeline_mode = #tpu.pipeline_mode<synchronous>, transform_indices = @transform_7, window_bounds = array<i64: 8, 8>}, {pipeline_mode = #tpu.pipeline_mode<synchronous>, transform_indices = @transform_8, window_bounds = array<i64: 8, 1>}, {transform_indices = @transform_9, window_bounds = array<i64: 1, 8, 128>}]} {
    %c0_i32 = arith.constant 0 : i32
    %0 = arith.cmpi eq, %arg1, %c0_i32 : i32
    %1 = arith.extui %0 : i1 to i32
    %c0_i32_0 = arith.constant 0 : i32
    %2 = arith.cmpi ne, %1, %c0_i32_0 : i32
    scf.if %2 {
      %cst_28 = arith.constant 0.000000e+00 : f32
      %70 = vector.broadcast %cst_28 : f32 to vector<8x1xf32>
      %cst_29 = arith.constant 0.000000e+00 : f32
      %71 = vector.broadcast %cst_29 : f32 to vector<8x1xf32>
      %c0_30 = arith.constant 0 : index
      %c0_31 = arith.constant 0 : index
      %c0_32 = arith.constant 0 : index
      %72 = vector.load %arg2[%c0_30, %c0_31, %c0_32] : memref<1x8x256xf32, #tpu.memory_space<vmem>>, vector<1x8x128xf32>
      %73 = vector.shape_cast %72 : vector<1x8x128xf32> to vector<8x128xf32>
      %cst_33 = arith.constant dense<0.000000e+00> : vector<8xf32>
      %74 = vector.multi_reduction <add>, %73, %cst_33 [1] : vector<8x128xf32> to vector<8xf32>
      %75 = vector.shape_cast %74 : vector<8xf32> to vector<8x1xf32>
      %76 = arith.addf %70, %75 : vector<8x1xf32>
      %77 = arith.mulf %73, %73 : vector<8x128xf32>
      %cst_34 = arith.constant dense<0.000000e+00> : vector<8xf32>
      %78 = vector.multi_reduction <add>, %77, %cst_34 [1] : vector<8x128xf32> to vector<8xf32>
      %79 = vector.shape_cast %78 : vector<8xf32> to vector<8x1xf32>
      %80 = arith.addf %71, %79 : vector<8x1xf32>
      %c0_35 = arith.constant 0 : index
      %c0_36 = arith.constant 0 : index
      %c128 = arith.constant 128 : index
      %81 = vector.load %arg2[%c0_35, %c0_36, %c128] : memref<1x8x256xf32, #tpu.memory_space<vmem>>, vector<1x8x128xf32>
      %82 = vector.shape_cast %81 : vector<1x8x128xf32> to vector<8x128xf32>
      %cst_37 = arith.constant dense<0.000000e+00> : vector<8xf32>
      %83 = vector.multi_reduction <add>, %82, %cst_37 [1] : vector<8x128xf32> to vector<8xf32>
      %84 = vector.shape_cast %83 : vector<8xf32> to vector<8x1xf32>
      %85 = arith.addf %76, %84 : vector<8x1xf32>
      %86 = arith.mulf %82, %82 : vector<8x128xf32>
      %cst_38 = arith.constant dense<0.000000e+00> : vector<8xf32>
      %87 = vector.multi_reduction <add>, %86, %cst_38 [1] : vector<8x128xf32> to vector<8xf32>
      %88 = vector.shape_cast %87 : vector<8xf32> to vector<8x1xf32>
      %89 = arith.addf %80, %88 : vector<8x1xf32>
      %c0_39 = arith.constant 0 : index
      %c0_40 = arith.constant 0 : index
      %90 = vector.load %arg5[%c0_39, %c0_40] : memref<4x8xf32, #tpu.memory_space<vmem>>, vector<4x8xf32>
      %cst_41 = arith.constant dense<0.000000e+00> : vector<4x1xf32>
      %91 = tpu.matmul %90, %85, %cst_41 {dimension_numbers = #tpu.dot_dimension_numbers<[1], [0], [0], [1], [0, 0, 1, 1], [], []>} : vector<4x8xf32>, vector<8x1xf32>, vector<4x1xf32> -> vector<4x1xf32>
      %cst_42 = arith.constant 5.120000e+02 : f32
      %92 = vector.broadcast %cst_42 : f32 to vector<4x1xf32>
      %93 = arith.divf %91, %92 : vector<4x1xf32>
      %c0_43 = arith.constant 0 : index
      %c0_44 = arith.constant 0 : index
      %94 = vector.load %arg5[%c0_43, %c0_44] : memref<4x8xf32, #tpu.memory_space<vmem>>, vector<4x8xf32>
      %cst_45 = arith.constant dense<0.000000e+00> : vector<4x1xf32>
      %95 = tpu.matmul %94, %89, %cst_45 {dimension_numbers = #tpu.dot_dimension_numbers<[1], [0], [0], [1], [0, 0, 1, 1], [], []>} : vector<4x8xf32>, vector<8x1xf32>, vector<4x1xf32> -> vector<4x1xf32>
      %cst_46 = arith.constant 5.120000e+02 : f32
      %96 = vector.broadcast %cst_46 : f32 to vector<4x1xf32>
      %97 = arith.divf %95, %96 : vector<4x1xf32>
      %98 = arith.mulf %93, %93 : vector<4x1xf32>
      %99 = arith.subf %97, %98 : vector<4x1xf32>
      %cst_47 = arith.constant 0.000000e+00 : f32
      %100 = vector.broadcast %cst_47 : f32 to vector<4x1xf32>
      %101 = arith.maximumf %99, %100 : vector<4x1xf32>
      %cst_48 = arith.constant 9.99999974E-6 : f32
      %102 = vector.broadcast %cst_48 : f32 to vector<4x1xf32>
      %103 = arith.addf %101, %102 : vector<4x1xf32>
      %104 = math.rsqrt %103 : vector<4x1xf32>
      %c0_49 = arith.constant 0 : index
      %c0_50 = arith.constant 0 : index
      %105 = vector.load %arg6[%c0_49, %c0_50] : memref<8x4xf32, #tpu.memory_space<vmem>>, vector<8x4xf32>
      %cst_51 = arith.constant dense<0.000000e+00> : vector<8x1xf32>
      %106 = tpu.matmul %105, %93, %cst_51 {dimension_numbers = #tpu.dot_dimension_numbers<[1], [0], [0], [1], [0, 0, 1, 1], [], []>} : vector<8x4xf32>, vector<4x1xf32>, vector<8x1xf32> -> vector<8x1xf32>
      %c0_52 = arith.constant 0 : index
      %c0_53 = arith.constant 0 : index
      %107 = vector.load %arg6[%c0_52, %c0_53] : memref<8x4xf32, #tpu.memory_space<vmem>>, vector<8x4xf32>
      %cst_54 = arith.constant dense<0.000000e+00> : vector<8x1xf32>
      %108 = tpu.matmul %107, %104, %cst_54 {dimension_numbers = #tpu.dot_dimension_numbers<[1], [0], [0], [1], [0, 0, 1, 1], [], []>} : vector<8x4xf32>, vector<4x1xf32>, vector<8x1xf32> -> vector<8x1xf32>
      %c0_55 = arith.constant 0 : index
      %c0_56 = arith.constant 0 : index
      %109 = vector.load %arg3[%c0_55, %c0_56] : memref<8x1xf32, #tpu.memory_space<vmem>>, vector<8x1xf32>
      %110 = arith.mulf %108, %109 : vector<8x1xf32>
      %c0_57 = arith.constant 0 : index
      %c0_58 = arith.constant 0 : index
      %111 = vector.load %arg4[%c0_57, %c0_58] : memref<8x1xf32, #tpu.memory_space<vmem>>, vector<8x1xf32>
      %112 = arith.mulf %106, %110 : vector<8x1xf32>
      %113 = arith.subf %111, %112 : vector<8x1xf32>
      %c0_59 = arith.constant 0 : index
      %c0_60 = arith.constant 0 : index
      %114 = vector.load %arg7[%c0_59, %c0_60] : memref<24x8xf32, #tpu.memory_space<vmem>>, vector<24x8xf32>
      %c0_61 = arith.constant 0 : index
      %c0_62 = arith.constant 0 : index
      %115 = vector.load %arg8[%c0_61, %c0_62] : memref<24x1xf32, #tpu.memory_space<vmem>>, vector<24x1xf32>
      %c0_63 = arith.constant 0 : index
      %c0_64 = arith.constant 0 : index
      %c0_65 = arith.constant 0 : index
      %116 = vector.load %arg2[%c0_63, %c0_64, %c0_65] : memref<1x8x256xf32, #tpu.memory_space<vmem>>, vector<1x8x128xf32>
      %117 = vector.shape_cast %116 : vector<1x8x128xf32> to vector<8x128xf32>
      %118 = vector.broadcast %110 : vector<8x1xf32> to vector<8x128xf32>
      %119 = arith.mulf %117, %118 : vector<8x128xf32>
      %120 = vector.broadcast %113 : vector<8x1xf32> to vector<8x128xf32>
      %121 = arith.addf %119, %120 : vector<8x128xf32>
      %cst_66 = arith.constant dense<0.000000e+00> : vector<24x128xf32>
      %122 = tpu.matmul %114, %121, %cst_66 {dimension_numbers = #tpu.dot_dimension_numbers<[1], [0], [0], [1], [0, 0, 1, 1], [], []>} : vector<24x8xf32>, vector<8x128xf32>, vector<24x128xf32> -> vector<24x128xf32>
      %123 = vector.broadcast %115 : vector<24x1xf32> to vector<24x128xf32>
      %124 = arith.addf %122, %123 : vector<24x128xf32>
      %125 = vector.extract_strided_slice %124 {offsets = [0, 0], sizes = [8, 128], strides = [1, 1]} : vector<24x128xf32> to vector<8x128xf32>
      %c0_67 = arith.constant 0 : index
      %c0_68 = arith.constant 0 : index
      %126 = vector.load %arg12[%c0_67, %c0_68] : memref<8x256xf32, #tpu.memory_space<vmem>>, vector<8x128xf32>
      tpu.vector_store %arg12[%c0_67, %c0_68], %125 {strides = array<i32>} : memref<8x256xf32, #tpu.memory_space<vmem>>, vector<8x128xf32>,
      %127 = vector.extract_strided_slice %124 {offsets = [8, 0], sizes = [8, 128], strides = [1, 1]} : vector<24x128xf32> to vector<8x128xf32>
      %c0_69 = arith.constant 0 : index
      %c0_70 = arith.constant 0 : index
      %128 = vector.load %arg13[%c0_69, %c0_70] : memref<8x256xf32, #tpu.memory_space<vmem>>, vector<8x128xf32>
      tpu.vector_store %arg13[%c0_69, %c0_70], %127 {strides = array<i32>} : memref<8x256xf32, #tpu.memory_space<vmem>>, vector<8x128xf32>,
      %129 = vector.extract_strided_slice %124 {offsets = [16, 0], sizes = [8, 128], strides = [1, 1]} : vector<24x128xf32> to vector<8x128xf32>
      %c0_71 = arith.constant 0 : index
      %c0_72 = arith.constant 0 : index
      %130 = vector.load %arg14[%c0_71, %c0_72] : memref<8x256xf32, #tpu.memory_space<vmem>>, vector<8x128xf32>
      tpu.vector_store %arg14[%c0_71, %c0_72], %129 {strides = array<i32>} : memref<8x256xf32, #tpu.memory_space<vmem>>, vector<8x128xf32>,
      %c0_73 = arith.constant 0 : index
      %c0_74 = arith.constant 0 : index
      %c128_75 = arith.constant 128 : index
      %131 = vector.load %arg2[%c0_73, %c0_74, %c128_75] : memref<1x8x256xf32, #tpu.memory_space<vmem>>, vector<1x8x128xf32>
      %132 = vector.shape_cast %131 : vector<1x8x128xf32> to vector<8x128xf32>
      %133 = vector.broadcast %110 : vector<8x1xf32> to vector<8x128xf32>
      %134 = arith.mulf %132, %133 : vector<8x128xf32>
      %135 = vector.broadcast %113 : vector<8x1xf32> to vector<8x128xf32>
      %136 = arith.addf %134, %135 : vector<8x128xf32>
      %cst_76 = arith.constant dense<0.000000e+00> : vector<24x128xf32>
      %137 = tpu.matmul %114, %136, %cst_76 {dimension_numbers = #tpu.dot_dimension_numbers<[1], [0], [0], [1], [0, 0, 1, 1], [], []>} : vector<24x8xf32>, vector<8x128xf32>, vector<24x128xf32> -> vector<24x128xf32>
      %138 = vector.broadcast %115 : vector<24x1xf32> to vector<24x128xf32>
      %139 = arith.addf %137, %138 : vector<24x128xf32>
      %140 = vector.extract_strided_slice %139 {offsets = [0, 0], sizes = [8, 128], strides = [1, 1]} : vector<24x128xf32> to vector<8x128xf32>
      %c0_77 = arith.constant 0 : index
      %c128_78 = arith.constant 128 : index
      %141 = vector.load %arg12[%c0_77, %c128_78] : memref<8x256xf32, #tpu.memory_space<vmem>>, vector<8x128xf32>
      tpu.vector_store %arg12[%c0_77, %c128_78], %140 {strides = array<i32>} : memref<8x256xf32, #tpu.memory_space<vmem>>, vector<8x128xf32>,
      %142 = vector.extract_strided_slice %139 {offsets = [8, 0], sizes = [8, 128], strides = [1, 1]} : vector<24x128xf32> to vector<8x128xf32>
      %c0_79 = arith.constant 0 : index
      %c128_80 = arith.constant 128 : index
      %143 = vector.load %arg13[%c0_79, %c128_80] : memref<8x256xf32, #tpu.memory_space<vmem>>, vector<8x128xf32>
      tpu.vector_store %arg13[%c0_79, %c128_80], %142 {strides = array<i32>} : memref<8x256xf32, #tpu.memory_space<vmem>>, vector<8x128xf32>,
      %144 = vector.extract_strided_slice %139 {offsets = [16, 0], sizes = [8, 128], strides = [1, 1]} : vector<24x128xf32> to vector<8x128xf32>
      %c0_81 = arith.constant 0 : index
      %c128_82 = arith.constant 128 : index
      %145 = vector.load %arg14[%c0_81, %c128_82] : memref<8x256xf32, #tpu.memory_space<vmem>>, vector<8x128xf32>
      tpu.vector_store %arg14[%c0_81, %c128_82], %144 {strides = array<i32>} : memref<8x256xf32, #tpu.memory_space<vmem>>, vector<8x128xf32>,
    } else {
    }
    %c128_i32 = arith.constant 128 : i32
    %3 = arith.muli %arg1, %c128_i32 : i32
    %4 = tpu.assume_multiple %3, 128 : i32
    %c0 = arith.constant 0 : index
    %5 = arith.index_cast %4 : i32 to index
    %6 = vector.load %arg12[%c0, %5] : memref<8x256xf32, #tpu.memory_space<vmem>>, vector<8x128xf32>
    %cst = arith.constant 0xFF800000 : f32
    %7 = vector.broadcast %cst : f32 to vector<1x128xf32>
    %cst_1 = arith.constant 0.000000e+00 : f32
    %8 = vector.broadcast %cst_1 : f32 to vector<1x128xf32>
    %cst_2 = arith.constant 0.000000e+00 : f32
    %9 = vector.broadcast %cst_2 : f32 to vector<8x128xf32>
    %c0_i32_3 = arith.constant 0 : i32
    %c128_i32_4 = arith.constant 128 : i32
    %10 = arith.muli %c0_i32_3, %c128_i32_4 : i32
    %11 = tpu.assume_multiple %10, 128 : i32
    %c0_5 = arith.constant 0 : index
    %12 = arith.index_cast %11 : i32 to index
    %13 = vector.load %arg13[%c0_5, %12] : memref<8x256xf32, #tpu.memory_space<vmem>>, vector<8x128xf32>
    %c0_6 = arith.constant 0 : index
    %14 = arith.index_cast %11 : i32 to index
    %15 = vector.load %arg14[%c0_6, %14] : memref<8x256xf32, #tpu.memory_space<vmem>>, vector<8x128xf32>
    %cst_7 = arith.constant dense<0.000000e+00> : vector<128x128xf32>
    %16 = tpu.matmul %13, %6, %cst_7 {dimension_numbers = #tpu.dot_dimension_numbers<[0], [0], [1], [1], [0, 1, 1, 1], [], []>} : vector<8x128xf32>, vector<8x128xf32>, vector<128x128xf32> -> vector<128x128xf32>
    %cst_8 = arith.constant dense<0xFF800000> : vector<128xf32>
    %17 = vector.multi_reduction <maximumf>, %16, %cst_8 [0] : vector<128x128xf32> to vector<128xf32>
    %18 = vector.shape_cast %17 : vector<128xf32> to vector<1x128xf32>
    %19 = arith.maximumf %7, %18 : vector<1x128xf32>
    %20 = arith.subf %7, %19 : vector<1x128xf32>
    %21 = math.exp %20 : vector<1x128xf32>
    %22 = vector.broadcast %19 : vector<1x128xf32> to vector<128x128xf32>
    %23 = arith.subf %16, %22 : vector<128x128xf32>
    %24 = math.exp %23 : vector<128x128xf32>
    %25 = arith.mulf %21, %8 : vector<1x128xf32>
    %cst_9 = arith.constant dense<0.000000e+00> : vector<128xf32>
    %26 = vector.multi_reduction <add>, %24, %cst_9 [0] : vector<128x128xf32> to vector<128xf32>
    %27 = vector.shape_cast %26 : vector<128xf32> to vector<1x128xf32>
    %28 = arith.addf %25, %27 : vector<1x128xf32>
    %29 = vector.broadcast %21 : vector<1x128xf32> to vector<8x128xf32>
    %30 = arith.mulf %29, %9 : vector<8x128xf32>
    %cst_10 = arith.constant dense<0.000000e+00> : vector<8x128xf32>
    %31 = tpu.matmul %15, %24, %cst_10 {dimension_numbers = #tpu.dot_dimension_numbers<[1], [0], [0], [1], [0, 0, 1, 1], [], []>} : vector<8x128xf32>, vector<128x128xf32>, vector<8x128xf32> -> vector<8x128xf32>
    %32 = arith.addf %30, %31 : vector<8x128xf32>
    %c1_i32 = arith.constant 1 : i32
    %c128_i32_11 = arith.constant 128 : i32
    %33 = arith.muli %c1_i32, %c128_i32_11 : i32
    %34 = tpu.assume_multiple %33, 128 : i32
    %c0_12 = arith.constant 0 : index
    %35 = arith.index_cast %34 : i32 to index
    %36 = vector.load %arg13[%c0_12, %35] : memref<8x256xf32, #tpu.memory_space<vmem>>, vector<8x128xf32>
    %c0_13 = arith.constant 0 : index
    %37 = arith.index_cast %34 : i32 to index
    %38 = vector.load %arg14[%c0_13, %37] : memref<8x256xf32, #tpu.memory_space<vmem>>, vector<8x128xf32>
    %cst_14 = arith.constant dense<0.000000e+00> : vector<128x128xf32>
    %39 = tpu.matmul %36, %6, %cst_14 {dimension_numbers = #tpu.dot_dimension_numbers<[0], [0], [1], [1], [0, 1, 1, 1], [], []>} : vector<8x128xf32>, vector<8x128xf32>, vector<128x128xf32> -> vector<128x128xf32>
    %cst_15 = arith.constant dense<0xFF800000> : vector<128xf32>
    %40 = vector.multi_reduction <maximumf>, %39, %cst_15 [0] : vector<128x128xf32> to vector<128xf32>
    %41 = vector.shape_cast %40 : vector<128xf32> to vector<1x128xf32>
    %42 = arith.maximumf %19, %41 : vector<1x128xf32>
    %43 = arith.subf %19, %42 : vector<1x128xf32>
    %44 = math.exp %43 : vector<1x128xf32>
    %45 = vector.broadcast %42 : vector<1x128xf32> to vector<128x128xf32>
    %46 = arith.subf %39, %45 : vector<128x128xf32>
    %47 = math.exp %46 : vector<128x128xf32>
    %48 = arith.mulf %44, %28 : vector<1x128xf32>
    %cst_16 = arith.constant dense<0.000000e+00> : vector<128xf32>
    %49 = vector.multi_reduction <add>, %47, %cst_16 [0] : vector<128x128xf32> to vector<128xf32>
    %50 = vector.shape_cast %49 : vector<128xf32> to vector<1x128xf32>
    %51 = arith.addf %48, %50 : vector<1x128xf32>
    %52 = vector.broadcast %44 : vector<1x128xf32> to vector<8x128xf32>
    %53 = arith.mulf %52, %32 : vector<8x128xf32>
    %cst_17 = arith.constant dense<0.000000e+00> : vector<8x128xf32>
    %54 = tpu.matmul %38, %47, %cst_17 {dimension_numbers = #tpu.dot_dimension_numbers<[1], [0], [0], [1], [0, 0, 1, 1], [], []>} : vector<8x128xf32>, vector<128x128xf32>, vector<8x128xf32> -> vector<8x128xf32>
    %55 = arith.addf %53, %54 : vector<8x128xf32>
    %c2_i32 = arith.constant 2 : i32
    %56 = vector.broadcast %51 : vector<1x128xf32> to vector<8x128xf32>
    %57 = arith.divf %55, %56 : vector<8x128xf32>
    %c0_18 = arith.constant 0 : index
    %c0_19 = arith.constant 0 : index
    %58 = vector.load %arg9[%c0_18, %c0_19] : memref<8x8xf32, #tpu.memory_space<vmem>>, vector<8x8xf32>
    %cst_20 = arith.constant dense<0.000000e+00> : vector<8x128xf32>
    %59 = tpu.matmul %58, %57, %cst_20 {dimension_numbers = #tpu.dot_dimension_numbers<[1], [0], [0], [1], [0, 0, 1, 1], [], []>} : vector<8x8xf32>, vector<8x128xf32>, vector<8x128xf32> -> vector<8x128xf32>
    %c0_21 = arith.constant 0 : index
    %c0_22 = arith.constant 0 : index
    %60 = vector.load %arg10[%c0_21, %c0_22] : memref<8x1xf32, #tpu.memory_space<vmem>>, vector<8x1xf32>
    %61 = vector.broadcast %60 : vector<8x1xf32> to vector<8x128xf32>
    %62 = arith.addf %59, %61 : vector<8x128xf32>
    %c0_23 = arith.constant 0 : index
    %c0_24 = arith.constant 0 : index
    %63 = arith.index_cast %4 : i32 to index
    %64 = vector.load %arg2[%c0_23, %c0_24, %63] : memref<1x8x256xf32, #tpu.memory_space<vmem>>, vector<1x8x128xf32>
    %65 = vector.shape_cast %64 : vector<1x8x128xf32> to vector<8x128xf32>
    %66 = arith.addf %62, %65 : vector<8x128xf32>
    %c0_25 = arith.constant 0 : index
    %c0_26 = arith.constant 0 : index
    %c0_27 = arith.constant 0 : index
    %67 = vector.load %arg11[%c0_25, %c0_26, %c0_27] : memref<1x8x128xf32, #tpu.memory_space<vmem>>, vector<1x8x128xf32>
    %68 = vector.shape_cast %67 : vector<1x8x128xf32> to vector<8x128xf32>
    %69 = vector.shape_cast %66 : vector<8x128xf32> to vector<1x8x128xf32>
    tpu.vector_store %arg11[%c0_25, %c0_26, %c0_27], %69 {strides = array<i32>} : memref<1x8x128xf32, #tpu.memory_space<vmem>>, vector<1x8x128xf32>,
    return
  }
  func.func @transform_0(%arg0: i32, %arg1: i32) -> (i32, i32, i32) {
    %c0_i32 = arith.constant 0 : i32
    %c0_i32_0 = arith.constant 0 : i32
    %c0_i32_1 = arith.constant 0 : i32
    return %arg0, %c0_i32, %c0_i32_0 : i32, i32, i32
  }
  func.func @transform_1(%arg0: i32, %arg1: i32) -> (i32, i32) {
    %c0_i32 = arith.constant 0 : i32
    %c0_i32_0 = arith.constant 0 : i32
    %c0_i32_1 = arith.constant 0 : i32
    return %c0_i32, %c0_i32_0 : i32, i32
  }
  func.func @transform_2(%arg0: i32, %arg1: i32) -> (i32, i32) {
    %c0_i32 = arith.constant 0 : i32
    %c0_i32_0 = arith.constant 0 : i32
    %c0_i32_1 = arith.constant 0 : i32
    return %c0_i32, %c0_i32_0 : i32, i32
  }
  func.func @transform_3(%arg0: i32, %arg1: i32) -> (i32, i32) {
    %c0_i32 = arith.constant 0 : i32
    %c0_i32_0 = arith.constant 0 : i32
    %c0_i32_1 = arith.constant 0 : i32
    return %c0_i32, %c0_i32_0 : i32, i32
  }
  func.func @transform_4(%arg0: i32, %arg1: i32) -> (i32, i32) {
    %c0_i32 = arith.constant 0 : i32
    %c0_i32_0 = arith.constant 0 : i32
    %c0_i32_1 = arith.constant 0 : i32
    return %c0_i32, %c0_i32_0 : i32, i32
  }
  func.func @transform_5(%arg0: i32, %arg1: i32) -> (i32, i32) {
    %c0_i32 = arith.constant 0 : i32
    %c0_i32_0 = arith.constant 0 : i32
    %c0_i32_1 = arith.constant 0 : i32
    return %c0_i32, %c0_i32_0 : i32, i32
  }
  func.func @transform_6(%arg0: i32, %arg1: i32) -> (i32, i32) {
    %c0_i32 = arith.constant 0 : i32
    %c0_i32_0 = arith.constant 0 : i32
    %c0_i32_1 = arith.constant 0 : i32
    return %c0_i32, %c0_i32_0 : i32, i32
  }
  func.func @transform_7(%arg0: i32, %arg1: i32) -> (i32, i32) {
    %c0_i32 = arith.constant 0 : i32
    %c0_i32_0 = arith.constant 0 : i32
    %c0_i32_1 = arith.constant 0 : i32
    return %c0_i32, %c0_i32_0 : i32, i32
  }
  func.func @transform_8(%arg0: i32, %arg1: i32) -> (i32, i32) {
    %c0_i32 = arith.constant 0 : i32
    %c0_i32_0 = arith.constant 0 : i32
    %c0_i32_1 = arith.constant 0 : i32
    return %c0_i32, %c0_i32_0 : i32, i32
  }
  func.func @transform_9(%arg0: i32, %arg1: i32) -> (i32, i32, i32) {
    %c0_i32 = arith.constant 0 : i32
    %c0_i32_0 = arith.constant 0 : i32
    return %arg0, %c0_i32, %arg1 : i32, i32, i32
  }
}

</mosaic_0001>

<bundles_post_ra>
// kernel: tpu_custom_call.1
= control target key start
LH: loop header
LB: loop body
LE: loop exit
PB: predicated region body
PF: predicated region fallthrough
CT: control target
= control target key end

     0   :  { %s2945_s0 = inlined_call_operand.vmem [shape: f32[2,8,256], index: 0, kind: input, shape index: {}]   ;;  %s2946_s1 = inlined_call_operand.vmem [shape: f32[8,1], index: 1, kind: input, shape index: {}]   ;;  %s2947_s2 = inlined_call_operand.vmem [shape: f32[8,1], index: 2, kind: input, shape index: {}]   ;;  %s2948_s3 = inlined_call_operand.vmem [shape: f32[4,8], index: 3, kind: input, shape index: {}]   ;;  %s2949_s4 = inlined_call_operand.vmem [shape: f32[8,4], index: 4, kind: input, shape index: {}]   ;;  %s2950_s5 = inlined_call_operand.vmem [shape: f32[24,8], index: 5, kind: input, shape index: {}]   ;;  %s2951_s6 = inlined_call_operand.vmem [shape: f32[24,1], index: 6, kind: input, shape index: {}]   ;;  %s2952_s7 = inlined_call_operand.vmem [shape: f32[8,8], index: 7, kind: input, shape index: {}]   ;;  %s2953_s8 = inlined_call_operand.vmem [shape: f32[8,1], index: 8, kind: input, shape index: {}]   ;;  %s2954_s9 = inlined_call_operand.hbm [shape: f32[2,8,256], index: 9, kind: output, shape index: {}]  }
   0x1   :  { %2958 = sst [smem:[#allocation10_spill]] %s2945_s0 }
   0x2   :  { %2959 = sst [smem:[#allocation11_spill]] %s2946_s1 }
   0x3   :  { %2960 = sst [smem:[#allocation12_spill]] %s2947_s2 }
   0x4   :  { %14 = vsyncpa [#allocation6], 0 }
   0x5   :  { %16 = vsyncpa [#allocation6 + $0x1], 0  ;;  %s2536_s30 = smov 0   ;;  %s2538_s10 = smov 0  }
   0x6   :  { %s2540_s11 = smov 0   ;;  %s2542_s12 = smov 0  }
   0x7   :  { %s2544_s13 = smov 0   ;;  %s2546_s14 = smov 0  }
   0x8   :  { %s2548_s15 = smov 0   ;;  %s2550_s16 = smov 0  }
   0x9 LB: > { %s1862_s17 = sadd.s32 4294967295, %s2476_s16   ;;  %s1863_s18 = sadd.s32 4294967294, %s2476_s16   ;;  %s2476_s16 = sphi %s2550_s16, %s22_s16   ;;  %s2472_s15 = sphi %s2548_s15, %s2979_s15   ;;  %s2468_s14 = sphi %s2546_s14, %s2978_s14   ;;  %s2464_s13 = sphi %s2544_s13, %s2977_s13   ;;  %s2460_s12 = sphi %s2542_s12, %s2976_s12   ;;  %s2456_s11 = sphi %s2540_s11, %s2975_s11   ;;  %s2452_s10 = sphi %s2538_s10, %s2974_s10   ;;  %s2448_s30 = sphi %s2536_s30, %s2973_s30  }
   0xa   : > { %s31_s19 = sadd.s32 1, %s2468_s14  ;;  %s34_s20 = sadd.s32 1, %s2472_s15 }
   0xb   : > { %p32_p0 = scmp.ge.s32.totalorder %s31_s19, 2  ;;  %p247_p1 = scmp.ne.s32.totalorder %s2456_s11, %s2452_s10 }
   0xc   : > { %p248_p2 = scmp.eq.s32.totalorder %s1862_s17, 3  ;;  %p253_p5 = scmp.ne.s32.totalorder %s2452_s10, %s2448_s30 }
   0xd   : > { %s2981_s19 = smov (%p32_p0, %s31_s19), 0  ;;  %s2983_s20 = smov (!%p32_p0, %s34_s20), %s2472_s15 }
   0xe   : > { %2961 = sst [smem:[#allocation8_spill]] %s2981_s19  ;;  %s233_s21 = ssub.s32 %s2468_s14, %s2981_s19 }
   0xf   : > { %p2587_p3 = por %p248_p2, %p247_p1  ;;  %p36_p4 = scmp.ge.s32.totalorder %s2983_s20, 2 }
  0x10   : > { %p254_p6 = scmp.eq.s32.totalorder %s1863_s18, 3  ;;  %p1866_p7 = scmp.ge.s32.totalorder %s2476_s16, 1 }
  0x11   : > { %s2985_s20 = smov (%p36_p4, %s2983_s20), 0  ;;  %p304_p9 = scmp.lt.s32.totalorder %s2476_s16, 5 }
  0x12   : > { %2963 = sst [smem:[#allocation9_spill]] %s2985_s20  ;;  %p2596_p8 = por %p254_p6, %p253_p5 }
  0x13   : > { %s232_s24 = ssub.s32 %s2472_s15, %s2985_s20  ;;  %s237_s25 = sadd.s32 1, %s2456_s11 }
  0x14   : > { %s234_s26 = sor.u32 %s233_s21, %s232_s24  ;;  %p305_p10 = pnand %p1866_p7, %p304_p9 }
  0x15   : > { %p235_p11 = scmp.eq.s32.totalorder %s234_s26, 0  ;;  %s2957_s28 = sand.u32 (!%p305_p10), 1, %s2452_s10  }
  0x16   : > { %308 = sbr.rel (%p305_p10) target bundleno = 1976 (0x7b8), region = 56  ;;  %p340_p12 = scmp.lt.s32.totalorder (!%p305_p10), %s2464_s13, 1 }
  0x17   : > { %s2605_s27 = scalar_select %p235_p11, %s2456_s11, %s237_s25  }
  0x18   : > { %s2611_s29 = sshll.u32 (!%p305_p10), %s2957_s28, 3  ;;  %s2965_s0 = sld [smem:[#allocation10_spill]] (!%p305_p10) }
  0x19   : > { %p1870_p13 = scmp.ne.s32.totalorder (!%p305_p10), %s2460_s12, 0 }
  0x1d   : > { %s341_s17 = scalar_select %p340_p12, %s2464_s13, 1 }
  0x1e   : > { %348 = sbr.rel (%p1870_p13) target bundleno = 989 (0x3dd), region = 60  ;;  %v2478_v4 = vmov (!%p1870_p13), 0.0   ;;  %vm2479_vm0 = vmmov (!%p1870_p13), 0   ;;  %v365_v9 = vld [vmem:[%s2948_s3] sm:$0xf] (!%p1870_p13)  ;;  %vm366_vm1 = vcmask (!%p1870_p13), 64512  }
  0x1f   : > { %s1924_s18 = sshll.u32 %s341_s17, 4  ;;  %2011 = vmatprep.subr.mxu0 (!%p1870_p13), %v2478_v4  ;;  %2016 = vmatprep.subr.mxu1 (!%p1870_p13), %v2478_v4  ;;  %vm523_vm2 = vcmask (!%p1870_p13), 1043456   ;;  %v518_v15 = vld [vmem:[%s2949_s4] sm:$0xff] (!%p1870_p13)  ;;  %vm519_vm3 = vcmask (!%p1870_p13), 31744   ;;  %v2480_v24 = vmov (!%p1870_p13), 0   ;;  %s2966_s1 = sld [smem:[#allocation11_spill]] (!%p1870_p13) }
  0x20   : > { %s2617_s21 = scalar_lea.vmem %s2965_s0, %s1924_s18  ;;  %2013 = vmatprep.mubr.msk.f32.mxu0 (!%p1870_p13), %vm2479_vm0, %v2478_v4  ;;  %2018 = vmatprep.mubr.msk.f32.mxu1 (!%p1870_p13), %vm2479_vm0, %v2478_v4  ;;  %s2967_s2 = sld [smem:[#allocation12_spill]] (!%p1870_p13)  ;;  %v678_v34 = vld [vmem:[%s2951_s6] sm:$0xff] (!%p1870_p13)  ;;  %v679_v35 = vld [vmem:[%s2951_s6 + $0x8] sm:$0xff] (!%p1870_p13)  ;;  %v680_v36 = vld [vmem:[%s2951_s6 + $0x10] sm:$0xff] (!%p1870_p13) }
  0x21   : > { %v2622_v0 = vld [vmem:[%s2617_s21] sm:$0xff] (!%p1870_p13)  ;;  %v2625_v1 = vld [vmem:[%s2617_s21 + $0x8] sm:$0xff] (!%p1870_p13)  ;;  %2306 = vset.pattern.permute.xlu0 (!%p1870_p13), %v2480_v24  ;;  %2307 = vset.pattern.permute.xlu1 (!%p1870_p13), %v2480_v24  ;;  %v677_v45 = vld [vmem:[%s2950_s5 + $0x10] sm:$0xff] (!%p1870_p13) }
  0x22   : > { %350 = vadd.xlane.f32.xlu0 (!%p1870_p13), %v2622_v0  ;;  %v353_v2 = vmul.f32 (!%p1870_p13), %v2622_v0, %v2622_v0  ;;  %v361_v3 = vmul.f32 (!%p1870_p13), %v2625_v1, %v2625_v1  ;;  %v675_v43 = vld [vmem:[%s2950_s5] sm:$0xff] (!%p1870_p13)  ;;  %v676_v44 = vld [vmem:[%s2950_s5 + $0x8] sm:$0xff] (!%p1870_p13) }
  0x24   : > { %354 = vadd.xlane.f32.xlu1 (!%p1870_p13), %v353_v2 }
  0x25   : > { %v670_v27 = vld [vmem:[%s2966_s1] sm:$0xff] }
  0x26   : > { %358 = vadd.xlane.f32.xlu0 %v2625_v1  ;;  %v672_v31 = vld [vmem:[%s2967_s2] sm:$0xff] }
  0x28   : > { %362 = vadd.xlane.f32.xlu1 %v361_v3 }
  0xaf   : > { %v351_v5 = vpop.xlane.xlu0 %350 }
  0xb1   : > { %v355_v6 = vpop.xlane.xlu1 %354 }
  0xb3   : > { %v359_v7 = vpop.xlane.xlu0 %358 }
  0xb4   : > { %v360_v8 = vadd.f32 %v359_v7, %v351_v5 }
  0xb5   : > { %v363_v10 = vpop.xlane.xlu1 %362 }
  0xb6   : > { %v364_v11 = vadd.f32 %v363_v10, %v355_v6  ;;  %2012 = vmatpush3.msra.mxu0 %v360_v8 }
  0xb7   : > { %2014 = vmatmul.mubr.msk.f32.vlgmr.msra.gmra.mrb[0].mxu0 %vm366_vm1, %v365_v9  ;;  %2021 = vmatprep.subr.mxu0 %v2478_v4 }
  0xb8   : > { %2017 = vmatpush3.msra.mxu1 %v364_v11  ;;  %2023 = vmatprep.mubr.msk.f32.mxu0 %vm2479_vm0, %v2478_v4 }
  0xb9   : > { %2019 = vmatmul.mubr.msk.f32.vlgmr.msra.gmra.mrb[0].mxu1 %vm366_vm1, %v365_v9  ;;  %2026 = vmatprep.subr.mxu1 %v2478_v4 }
  0xba   : > { %2028 = vmatprep.mubr.msk.f32.mxu1 %vm2479_vm0, %v2478_v4 }
 0x18a   : > { %v436_v12 = vpop.f32.mrb[0].mxu0 }
 0x18b   : > { %v441_v13 = vmul.f32 0.001953125, %v436_v12  ;;  %v2015_v14 = vpop.f32.mrb[1].mxu0 }
 0x18c   : > { %v508_v16 = vpop.f32.mrb[0].mxu1 }
 0x18d   : > { %v513_v17 = vmul.f32 %v441_v13, %v441_v13  ;;  %v512_v18 = vmul.f32 0.001953125, %v508_v16  ;;  %v2020_v19 = vpop.f32.mrb[1].mxu1  ;;  %2022 = vmatpush3.msk.msra.mxu0 %vm523_vm2, %v441_v13 }
 0x18e   : > { %2024 = vmatmul.mubr.msk.f32.vlgmr.msra.gmra.mrb[2].mxu0 %vm519_vm3, %v518_v15  ;;  %2031 = vmatprep.subr.mxu0 %v2478_v4 }
 0x18f   : > { %v514_v20 = vsub.f32 %v512_v18, %v513_v17  ;;  %2033 = vmatprep.mubr.msk.f32.mxu0 %vm2479_vm0, %v2478_v4 }
 0x191   : > { %v515_v21 = vmax.f32 %v514_v20, 0.0 }
 0x193   : > { %v516_v22 = vadd.f32 1e-05, %v515_v21 }
 0x195   : > { %2308 = vrsqrt.f32 %v516_v22 }
 0x19f   : > { %v2309_v23 = vpop.eup %2308 }
 0x1a0   : > { %2027 = vmatpush3.msk.msra.mxu1 %vm523_vm2, %v2309_v23 }
 0x1a1   : > { %2029 = vmatmul.mubr.msk.f32.vlgmr.msra.gmra.mrb[2].mxu1 %vm519_vm3, %v518_v15  ;;  %2042 = vmatprep.subr.mxu1 %v2478_v4 }
 0x1a2   : > { %2044 = vmatprep.mubr.msk.f32.mxu1 %vm2479_vm0, %v2478_v4 }
 0x261   : > { %v593_v25 = vpop.f32.mrb[2].mxu0 }
 0x262   : > { %v2025_v26 = vpop.f32.mrb[3].mxu0 }
 0x274   : > { %v666_v28 = vpop.f32.mrb[2].mxu1 }
 0x275   : > { %v671_v29 = vmul.f32 %v670_v27, %v666_v28  ;;  %v2030_v30 = vpop.f32.mrb[3].mxu1 }
 0x277   : > { %v673_v32 = vmul.f32 %v671_v29, %v593_v25  ;;  %683 = vperm.xlu0 %2306, %v671_v29  }
 0x279   : > { %v674_v33 = vsub.f32 %v672_v31, %v673_v32 }
 0x27b   : > { %689 = vperm.xlu1 %2307, %v674_v33  }
 0x27f   : > { %695 = vperm.xlu1 %2307, %v678_v34  }
 0x283   : > { %700 = vperm.xlu1 %2307, %v679_v35  }
 0x287   : > { %705 = vperm.xlu1 %2307, %v680_v36  }
 0x2f6   : > { %v684_v37 = vpop.permute.xlu0 %683 }
 0x2f7   : > { %v686_v38 = vmul.f32 %v684_v37, %v2622_v0  ;;  %v801_v39 = vmul.f32 %v684_v37, %v2625_v1 }
 0x2fa   : > { %v690_v40 = vpop.permute.xlu1 %689 }
 0x2fb   : > { %v692_v41 = vadd.f32 %v690_v40, %v686_v38  ;;  %v802_v42 = vadd.f32 %v801_v39, %v690_v40 }
 0x2fd   : > { %2032 = vmatpush3.msra.mxu0 %v692_v41  ;;  %2043 = vmatpush3.msra.mxu1 %v802_v42 }
 0x2fe   : > { %2034 = vmatmul.mubr.msk.f32.vlgmr.msra.gmra.mrb[4].mxu0 %vm366_vm1, %v675_v43  ;;  %2045 = vmatmul.mubr.msk.f32.vlgmr.msra.gmra.mrb[4].mxu1 %vm366_vm1, %v675_v43  ;;  %v696_v46 = vpop.permute.xlu1 %695 }
 0x2ff   : > { %2036 = vmatprep.mubr.msk.f32.mxu0 %vm2479_vm0, %v2478_v4  ;;  %2047 = vmatprep.mubr.msk.f32.mxu1 %vm2479_vm0, %v2478_v4 }
 0x302   : > { %2037 = vmatmul.mubr.msk.f32.gmra.mrb[6].mxu0 %vm366_vm1, %v676_v44  ;;  %2048 = vmatmul.mubr.msk.f32.gmra.mrb[6].mxu1 %vm366_vm1, %v676_v44  ;;  %v701_v47 = vpop.permute.xlu1 %700 }
 0x303   : > { %2039 = vmatprep.mubr.msk.f32.mxu0 %vm2479_vm0, %v2478_v4  ;;  %2050 = vmatprep.mubr.msk.f32.mxu1 %vm2479_vm0, %v2478_v4 }
 0x306   : > { %2040 = vmatmul.mubr.msk.f32.gmra.mrb[8].mxu0 %vm366_vm1, %v677_v45  ;;  %2051 = vmatmul.mubr.msk.f32.gmra.mrb[8].mxu1 %vm366_vm1, %v677_v45  ;;  %v706_v60 = vpop.permute.xlu1 %705 }
 0x3d1   : > { %v783_v48 = vpop.f32.mrb[4].mxu0  ;;  %v869_v49 = vpop.f32.mrb[4].mxu1 }
 0x3d2   : > { %v784_v50 = vadd.f32 %v783_v48, %v696_v46  ;;  %v870_v51 = vadd.f32 %v869_v49, %v696_v46  ;;  %v2035_v52 = vpop.f32.mrb[5].mxu0  ;;  %v2046_v53 = vpop.f32.mrb[5].mxu1 }
 0x3d4   : > { %797 = vst [vmem:[#allocation2] sm:$0xff] %v784_v50  ;;  %883 = vst [vmem:[#allocation2 + $0x8] sm:$0xff] %v870_v51 }
 0x3d5   : > { %v788_v54 = vpop.f32.mrb[6].mxu0  ;;  %v874_v55 = vpop.f32.mrb[6].mxu1 }
 0x3d6   : > { %v789_v56 = vadd.f32 %v788_v54, %v701_v47  ;;  %v875_v57 = vadd.f32 %v874_v55, %v701_v47  ;;  %v2038_v58 = vpop.f32.mrb[7].mxu0  ;;  %v2049_v59 = vpop.f32.mrb[7].mxu1 }
 0x3d8   : > { %798 = vst [vmem:[#allocation3] sm:$0xff] %v789_v56  ;;  %884 = vst [vmem:[#allocation3 + $0x8] sm:$0xff] %v875_v57 }
 0x3d9   : > { %v793_v61 = vpop.f32.mrb[8].mxu0  ;;  %v879_v62 = vpop.f32.mrb[8].mxu1 }
 0x3da   : > { %v794_v63 = vadd.f32 %v793_v61, %v706_v60  ;;  %v880_v0 = vadd.f32 %v879_v62, %v706_v60  ;;  %v2041_v1 = vpop.f32.mrb[9].mxu0  ;;  %v2052_v2 = vpop.f32.mrb[9].mxu1 }
 0x3dc   : > { %799 = vst [vmem:[#allocation4] sm:$0xff] %v794_v63  ;;  %885 = vst [vmem:[#allocation4 + $0x8] sm:$0xff] %v880_v0 }
 0x3dd PF: > { %s1883_s17 = sshll.u32 %s2460_s12, 7  ;;  %vm926_vm4 = vcmask 64512   ;;  %v2481_v38 = vmov 0.0|0.0   ;;  %vm2482_vm5 = vmmov 0   ;;  %v2483_v43 = vmov 0.0   ;;  %s2968_s0 = scalar_lea.vmem [#allocation5], %s2611_s29 }
 0x3de   : > { %s2702_s18 = sshra.s32 %s1883_s17, 7  ;;  %2180 = vmatprep.subr.bf16.mxu1 %v2481_v38  ;;  %2111 = vmatprep.mubr.msk.f32.mxu1 %vm2482_vm5, %v2483_v43  ;;  %s1920_s17 = sshll.u32 %s2464_s13, 1 }
 0x3df   : > { %v892_v3 = vld [vmem:[#allocation3] sm:$0xff]  ;;  %s1884_s19 = sshll.u32 %s2702_s18, 3  ;;  %v1287_v5 = vld [vmem:[#allocation3 + $0x8] sm:$0xff]  ;;  %s1782_s28 = sadd.s32 %s2460_s12, %s1920_s17 }
 0x3e0   : > { %894 = vxpose.xlu0.b32.start.end [1/1] (short) %v892_v3, 128  ;;  %s890_s20 = scalar_lea.vmem [#allocation2], %s1884_s19  ;;  %s1921_s24 = sshll.u32 %s1782_s28, 7 }
 0x3e1   : > { %v891_v4 = vld [vmem:[%s890_s20] sm:$0xff]  ;;  %s1766_s20 = scalar_lea.vmem %s2617_s21, %s1884_s19  ;;  %s1786_s1 = sshll.u32 %s2968_s0, 4  ;;  %s2890_s1 = int_to_ptr.vmem [resolvable:$true] %s1786_s1 }
 0x3e2   : > { %2053 = vmatprep.subr.mxu0 %v891_v4  ;;  %s2888_s2 = scalar_lea.hbm %s2954_s9, %s1921_s24  ;;  %s2969_s13 = smov %s2968_s0 }
 0x3e3   : > { %2054 = vmatpush3.msra.mxu0 %v891_v4  ;;  %s2970_s12 = sand.u32 1, %s2452_s10   ;;  %s2382_s18 = scalar_lea.vmem %s2890_s1, 128 }
 0x3e4   : > { %2114 = vmatprep.subr.mxu0 %v891_v4  ;;  %s1771_s21 = scalar_lea.sflag [#allocation6], %s2970_s12  ;;  %p2383_p0 = scmp.ne.s32.totalorder %s2890_s1, %s2382_s18 }
 0x3e5   : > { %s2485_s0 = smov [#allocation5]  }
 0x3e6   : > { %p2384_p1 = pnand %p2383_p0, %p2587_p3  ;;  %s2386_s19 = sshll.u32 %s2485_s0, 4  ;;  %s2387_s19 = int_to_ptr.vmem [resolvable:$false] %s2386_s19 }
 0x3e7   : > { %s2388_s17 = scalar_lea.vmem %s2387_s19, 256  ;;  %p2389_p4 = scmp.lt.s32.totalorder %s2890_s1, %s2387_s19 }
 0x3e8   : > { %p2385_p2 = pneg %p2384_p1  ;;  %p2390_p5 = scmp.lt.s32.totalorder %s2388_s17, %s2382_s18 }
 0x3ea   : > { %p2391_p6 = por %p2390_p5, %p2389_p4 }
 0x3ec   : > { %p2392_p7 = pnand %p2391_p6, %p2385_p2 }
 0x41d   : > { %1290 = vxpose.xlu0.b32.start.end [1/1] (short) %v1287_v5, 128 }
 0x460   : > { %v910_v6 = vpop.trf.xlu0 }
 0x461   : > { %2055 = vmatprep.mubr.msk.f32.mxu0 %vm926_vm4, %v910_v6 }
 0x464   : > { %v911_v7 = vpop.trf.xlu0 }
 0x465   : > { %2056 = vmatmul.mubr.msk.f32.vlgmr.msra.gmra.mrb[0].mxu0 %vm926_vm4, %v911_v7 }
 0x466   : > { %2115 = vmatpush3.msra.mxu0 %v891_v4 }
 0x467   : > { %2175 = vmatprep.subr.mxu0 %v2483_v43 }
 0x468   : > { %v912_v8 = vpop.trf.xlu0 }
 0x469   : > { %2058 = vmatprep.mubr.msk.f32.mxu0 %vm926_vm4, %v912_v8 }
 0x46c   : > { %v913_v9 = vpop.trf.xlu0 }
 0x46d   : > { %2059 = vmatmul.mubr.msk.f32.gmra.mrb[2].mxu0 %vm926_vm4, %v913_v9 }
 0x470   : > { %v914_v10 = vpop.trf.xlu0 }
 0x471   : > { %2061 = vmatprep.mubr.msk.f32.mxu0 %vm926_vm4, %v914_v10 }
 0x474   : > { %v915_v11 = vpop.trf.xlu0 }
 0x475   : > { %2062 = vmatmul.mubr.msk.f32.gmra.mrb[4].mxu0 %vm926_vm4, %v915_v11 }
 0x478   : > { %v916_v12 = vpop.trf.xlu0 }
 0x479   : > { %2064 = vmatprep.mubr.msk.f32.mxu0 %vm926_vm4, %v916_v12 }
 0x47c   : > { %v917_v13 = vpop.trf.xlu0 }
 0x47d   : > { %2065 = vmatmul.mubr.msk.f32.gmra.mrb[6].mxu0 %vm926_vm4, %v917_v13 }
 0x480   : > { %v918_v14 = vpop.trf.xlu0 }
 0x481   : > { %2067 = vmatprep.mubr.msk.f32.mxu0 %vm926_vm4, %v918_v14 }
 0x484   : > { %v919_v15 = vpop.trf.xlu0 }
 0x485   : > { %2068 = vmatmul.mubr.msk.f32.gmra.mrb[8].mxu0 %vm926_vm4, %v919_v15 }
 0x488   : > { %v920_v16 = vpop.trf.xlu0 }
 0x489   : > { %2070 = vmatprep.mubr.msk.f32.mxu0 %vm926_vm4, %v920_v16 }
 0x48c   : > { %v921_v17 = vpop.trf.xlu0 }
 0x48d   : > { %2071 = vmatmul.mubr.msk.f32.gmra.mrb[10].mxu0 %vm926_vm4, %v921_v17 }
 0x490   : > { %v922_v18 = vpop.trf.xlu0 }
 0x491   : > { %2073 = vmatprep.mubr.msk.f32.mxu0 %vm926_vm4, %v922_v18 }
 0x494   : > { %v923_v19 = vpop.trf.xlu0 }
 0x495   : > { %2074 = vmatmul.mubr.msk.f32.gmra.mrb[12].mxu0 %vm926_vm4, %v923_v19 }
 0x498   : > { %v924_v20 = vpop.trf.xlu0 }
 0x499   : > { %2076 = vmatprep.mubr.msk.f32.mxu0 %vm926_vm4, %v924_v20 }
 0x49c   : > { %v925_v21 = vpop.trf.xlu0 }
 0x49d   : > { %2077 = vmatmul.mubr.msk.f32.gmra.mrb[14].mxu0 %vm926_vm4, %v925_v21 }
 0x4a0   : > { %v1306_v22 = vpop.trf.xlu0 }
 0x4a1   : > { %2116 = vmatprep.mubr.msk.f32.mxu0 %vm926_vm4, %v1306_v22 }
 0x4a4   : > { %v1307_v23 = vpop.trf.xlu0 }
 0x4a5   : > { %2117 = vmatmul.mubr.msk.f32.vlgmr.msra.gmra.mrb[16].mxu0 %vm926_vm4, %v1307_v23 }
 0x4a8   : > { %v1308_v24 = vpop.trf.xlu0 }
 0x4a9   : > { %2119 = vmatprep.mubr.msk.f32.mxu0 %vm926_vm4, %v1308_v24 }
 0x4ac   : > { %v1309_v25 = vpop.trf.xlu0 }
 0x4ad   : > { %2120 = vmatmul.mubr.msk.f32.gmra.mrb[18].mxu0 %vm926_vm4, %v1309_v25 }
 0x4b0   : > { %v1310_v26 = vpop.trf.xlu0 }
 0x4b1   : > { %2122 = vmatprep.mubr.msk.f32.mxu0 %vm926_vm4, %v1310_v26 }
 0x4b4   : > { %v1311_v27 = vpop.trf.xlu0 }
 0x4b5   : > { %2123 = vmatmul.mubr.msk.f32.gmra.mrb[20].mxu0 %vm926_vm4, %v1311_v27 }
 0x4b8   : > { %v1312_v28 = vpop.trf.xlu0 }
 0x4b9   : > { %2125 = vmatprep.mubr.msk.f32.mxu0 %vm926_vm4, %v1312_v28 }
 0x4bc   : > { %v1313_v29 = vpop.trf.xlu0 }
 0x4bd   : > { %2126 = vmatmul.mubr.msk.f32.gmra.mrb[22].mxu0 %vm926_vm4, %v1313_v29 }
 0x4c0   : > { %v1314_v30 = vpop.trf.xlu0 }
 0x4c1   : > { %2128 = vmatprep.mubr.msk.f32.mxu0 %vm926_vm4, %v1314_v30 }
 0x4c4   : > { %v1315_v31 = vpop.trf.xlu0 }
 0x4c5   : > { %2129 = vmatmul.mubr.msk.f32.gmra.mrb[24].mxu0 %vm926_vm4, %v1315_v31 }
 0x4c8   : > { %v1316_v32 = vpop.trf.xlu0 }
 0x4c9   : > { %2131 = vmatprep.mubr.msk.f32.mxu0 %vm926_vm4, %v1316_v32 }
 0x4cc   : > { %v1317_v33 = vpop.trf.xlu0 }
 0x4cd   : > { %2132 = vmatmul.mubr.msk.f32.gmra.mrb[26].mxu0 %vm926_vm4, %v1317_v33 }
 0x4d0   : > { %v1318_v34 = vpop.trf.xlu0 }
 0x4d1   : > { %2134 = vmatprep.mubr.msk.f32.mxu0 %vm926_vm4, %v1318_v34 }
 0x4d4   : > { %v1319_v35 = vpop.trf.xlu0 }
 0x4d5   : > { %2135 = vmatmul.mubr.msk.f32.gmra.mrb[28].mxu0 %vm926_vm4, %v1319_v35 }
 0x4d8   : > { %v1320_v36 = vpop.trf.xlu0 }
 0x4d9   : > { %2137 = vmatprep.mubr.msk.f32.mxu0 %vm926_vm4, %v1320_v36 }
 0x4dc   : > { %v1321_v37 = vpop.trf.xlu0 }
 0x4dd   : > { %2138 = vmatmul.mubr.msk.f32.gmra.mrb[30].mxu0 %vm926_vm4, %v1321_v37 }
 0x4de   : > { %2177 = vmatprep.mubr.msk.f32.mxu0 %vm2482_vm5, %v2483_v43 }
 0x538   : > { %v2057_v39 = vpop.f32.mrb[0].mxu0 }
 0x539   : > { %v1041_v40 = vpop.f32.mrb[1].mxu0 }
 0x540   : > { %v2060_v41 = vpop.f32.mrb[2].mxu0 }
 0x541   : > { %v1051_v42 = vpop.f32.mrb[3].mxu0 }
 0x548   : > { %v2063_v44 = vpop.f32.mrb[4].mxu0 }
 0x549   : > { %v1121_v45 = vmax.f32 %v2057_v39, %v2063_v44  ;;  %v1061_v46 = vpop.f32.mrb[5].mxu0 }
 0x54a   : > { %v1120_v47 = vmax.f32 %v1041_v40, %v1061_v46 }
 0x550   : > { %v2066_v48 = vpop.f32.mrb[6].mxu0 }
 0x551   : > { %v1123_v49 = vmax.f32 %v2060_v41, %v2066_v48  ;;  %v1071_v50 = vpop.f32.mrb[7].mxu0 }
 0x552   : > { %v1122_v51 = vmax.f32 %v1051_v42, %v1071_v50 }
 0x558   : > { %v2745_v52 = vpop.f32.mrb[8].mxu0 }
 0x559   : > { %v1125_v53 = vmax.f32 %v1121_v45, %v2745_v52  ;;  %v1081_v54 = vpop.f32.mrb[9].mxu0 }
 0x55a   : > { %v1124_v55 = vmax.f32 %v1120_v47, %v1081_v54 }
 0x560   : > { %v2748_v56 = vpop.f32.mrb[10].mxu0 }
 0x561   : > { %v1127_v57 = vmax.f32 %v1123_v49, %v2748_v56  ;;  %v1091_v58 = vpop.f32.mrb[11].mxu0 }
 0x562   : > { %v1126_v59 = vmax.f32 %v1122_v51, %v1091_v58 }
 0x568   : > { %v2751_v60 = vpop.f32.mrb[12].mxu0 }
 0x569   : > { %v1129_v61 = vmax.f32 %v1125_v53, %v2751_v60  ;;  %v2754_v62 = vpop.f32.mrb[13].mxu0 }
 0x56a   : > { %v1128_v63 = vmax.f32 %v1124_v55, %v2754_v62 }
 0x56c   : > { %v1132_v0 = vmax.f32 %v1128_v63, %v1129_v61 }
 0x570   : > { %v2757_v1 = vpop.f32.mrb[14].mxu0 }
 0x571   : > { %v1131_v2 = vmax.f32 %v1127_v57, %v2757_v1  ;;  %v1111_v3 = vpop.f32.mrb[15].mxu0 }
 0x572   : > { %v1130_v4 = vmax.f32 %v1126_v59, %v1111_v3 }
 0x574   : > { %v1133_v5 = vmax.f32 %v1130_v4, %v1131_v2 }
 0x576   : > { %v1134_v6 = vmax.f32 %v1132_v0, %v1133_v5 }
 0x578   : > { %v1135_v7 = vrot.slane %v1134_v6, 4  ;;  %v2760_v8 = vpop.f32.mrb[16].mxu0 }
 0x579   : > { %v2762_v9 = vpop.f32.mrb[17].mxu0 }
 0x57a   : > { %v1136_v10 = vmax.f32 %v1134_v6, %v1135_v7 }
 0x57c   : > { %v1137_v11 = vrot.slane %v1136_v10, 2 }
 0x57e   : > { %v1138_v12 = vmax.f32 %v1136_v10, %v1137_v11 }
 0x580   : > { %v1139_v13 = vrot.slane %v1138_v12, 1  ;;  %v2764_v14 = vpop.f32.mrb[18].mxu0 }
 0x581   : > { %v2766_v15 = vpop.f32.mrb[19].mxu0 }
 0x582   : > { %v2768_v16 = vmax.f32 %v1138_v12, %v1139_v13 }
 0x584   : > { %v1158_v17 = vsub.f32 %v1111_v3, %v2768_v16  ;;  %v1144_v18 = vsub.f32 %v1041_v40, %v2768_v16  ;;  %v1145_v19 = vsub.f32 %v2057_v39, %v2768_v16  ;;  %v1146_v20 = vsub.f32 %v1051_v42, %v2768_v16 }
 0x585   : > { %v1147_v21 = vsub.f32 %v2060_v41, %v2768_v16  ;;  %v1148_v22 = vsub.f32 %v1061_v46, %v2768_v16  ;;  %v1149_v26 = vsub.f32 %v2063_v44, %v2768_v16  ;;  %v1150_v28 = vsub.f32 %v1071_v50, %v2768_v16 }
 0x586   : > { %v1188_v23 = vmul.f32 1.442695, %v1158_v17  ;;  %v1160_v24 = vmul.f32 1.442695, %v1144_v18  ;;  %v1162_v25 = vmul.f32 1.442695, %v1145_v19  ;;  %v1151_v31 = vsub.f32 %v2066_v48, %v2768_v16 }
 0x587   : > { %v1164_v27 = vmul.f32 1.442695, %v1146_v20  ;;  %v1166_v30 = vmul.f32 1.442695, %v1147_v21  ;;  %v1168_v34 = vmul.f32 1.442695, %v1148_v22  ;;  %v1152_v35 = vsub.f32 %v1081_v54, %v2768_v16 }
 0x588   : > { %2312 = vpow2.f32 %v1188_v23  ;;  %v2778_v29 = vpop.f32.mrb[20].mxu0  ;;  %v1170_v37 = vmul.f32 1.442695, %v1149_v26  ;;  %v1153_v39 = vsub.f32 %v2745_v52, %v2768_v16  ;;  %v1172_v40 = vmul.f32 1.442695, %v1150_v28 }
 0x589   : > { %v1516_v32 = vmax.f32 %v2760_v8, %v2778_v29  ;;  %v2783_v33 = vpop.f32.mrb[21].mxu0  ;;  %2314 = vpow2.f32 %v1160_v24  ;;  %v1154_v41 = vsub.f32 %v1091_v58, %v2768_v16  ;;  %v1174_v42 = vmul.f32 1.442695, %v1151_v31 }
 0x58a   : > { %v1515_v36 = vmax.f32 %v2762_v9, %v2783_v33  ;;  %2316 = vpow2.f32 %v1162_v25  ;;  %v1155_v44 = vsub.f32 %v2748_v56, %v2768_v16  ;;  %v1176_v45 = vmul.f32 1.442695, %v1152_v35 }
 0x58b   : > { %2318 = vpow2.f32 %v1164_v27  ;;  %v1156_v46 = vsub.f32 %v2754_v62, %v2768_v16  ;;  %v1178_v47 = vmul.f32 1.442695, %v1153_v39  ;;  %v1157_v48 = vsub.f32 %v2751_v60, %v2768_v16 }
 0x58c   : > { %2320 = vpow2.f32 %v1166_v30  ;;  %v1180_v49 = vmul.f32 1.442695, %v1154_v41  ;;  %v1159_v50 = vsub.f32 %v2757_v1, %v2768_v16  ;;  %v1182_v52 = vmul.f32 1.442695, %v1155_v44 }
 0x58d   : > { %2322 = vpow2.f32 %v1168_v34  ;;  %v1184_v55 = vmul.f32 1.442695, %v1156_v46  ;;  %v1186_v58 = vmul.f32 1.442695, %v1157_v48 }
 0x58e   : > { %2324 = vpow2.f32 %v1170_v37  ;;  %v1190_v60 = vmul.f32 1.442695, %v1159_v50 }
 0x58f   : > { %2326 = vpow2.f32 %v1172_v40 }
 0x590   : > { %v2799_v51 = vpop.f32.mrb[22].mxu0  ;;  %2328 = vpow2.f32 %v1174_v42 }
 0x591   : > { %v1518_v53 = vmax.f32 %v2764_v14, %v2799_v51  ;;  %v2803_v54 = vpop.f32.mrb[23].mxu0  ;;  %2330 = vpow2.f32 %v1176_v45 }
 0x592   : > { %v2805_v56 = vpop.eup %2312  ;;  %v1517_v57 = vmax.f32 %v2766_v15, %v2803_v54  ;;  %2332 = vpow2.f32 %v1178_v47 }
 0x593   : > { %v2315_v59 = vpop.eup %2314  ;;  %2334 = vpow2.f32 %v1180_v49 }
 0x594   : > { %v2317_v61 = vpop.eup %2316  ;;  %2336 = vpow2.f32 %v1182_v52 }
 0x595   : > { %v2319_v62 = vpop.eup %2318  ;;  %v1193_v63 = vadd.f32 %v2317_v61, %v2315_v59  ;;  %v2181_v0 = vpack.c.bf16 %v2317_v61, %v2315_v59  ;;  %2338 = vpow2.f32 %v1184_v55 }
 0x596   : > { %v2321_v1 = vpop.eup %2320  ;;  %2340 = vpow2.f32 %v1186_v58 }
 0x597   : > { %v2323_v2 = vpop.eup %2322  ;;  %2182 = vmatpush3.bf16.msra.mxu1 %v2181_v0  ;;  %v1194_v3 = vadd.f32 %v2319_v62, %v1193_v63  ;;  %v2184_v4 = vpack.c.bf16 %v2321_v1, %v2319_v62  ;;  %2342 = vpow2.f32 %v1190_v60  ;;  %v893_v63 = vld [vmem:[#allocation4] sm:$0xff] }
 0x598   : > { %v2325_v5 = vpop.eup %2324  ;;  %2183 = vmatprep.subr.bf16.mxu1 %v2481_v38  ;;  %v2810_v6 = vpop.f32.mrb[24].mxu0 }
 0x599   : > { %v2327_v7 = vpop.eup %2326  ;;  %v1520_v10 = vmax.f32 %v1516_v32, %v2810_v6  ;;  %v1195_v11 = vadd.f32 %v2321_v1, %v1194_v3  ;;  %v2813_v12 = vpop.f32.mrb[25].mxu0  ;;  %v2187_v13 = vpack.c.bf16 %v2325_v5, %v2323_v2 }
 0x59a   : > { %v2329_v17 = vpop.eup %2328  ;;  %v1519_v18 = vmax.f32 %v1515_v36, %v2813_v12 }
 0x59b   : > { %v2331_v19 = vpop.eup %2330  ;;  %2185 = vmatpush3.bf16.msra.mxu1 %v2184_v4  ;;  %v1196_v20 = vadd.f32 %v2323_v2, %v1195_v11  ;;  %v2190_v21 = vpack.c.bf16 %v2329_v17, %v2327_v7 }
 0x59c   : > { %v2333_v22 = vpop.eup %2332  ;;  %2186 = vmatprep.subr.bf16.mxu1 %v2481_v38 }
 0x59d   : > { %v2335_v23 = vpop.eup %2334  ;;  %v1197_v24 = vadd.f32 %v2325_v5, %v1196_v20  ;;  %v2193_v25 = vpack.c.bf16 %v2333_v22, %v2331_v19 }
 0x59e   : > { %v2337_v26 = vpop.eup %2336 }
 0x59f   : > { %v2339_v27 = vpop.eup %2338  ;;  %2188 = vmatpush3.bf16.msra.mxu1 %v2187_v13  ;;  %v1198_v28 = vadd.f32 %v2327_v7, %v1197_v24  ;;  %v2196_v30 = vpack.c.bf16 %v2337_v26, %v2335_v23  ;;  %v1141_v7 = vsub.f32 -inf, %v2768_v16 }
 0x5a0   : > { %v2341_v31 = vpop.eup %2340  ;;  %2189 = vmatprep.subr.bf16.mxu1 %v2481_v38  ;;  %v2818_v32 = vpop.f32.mrb[26].mxu0 }
 0x5a1   : > { %v2343_v34 = vpop.eup %2342  ;;  %v1522_v35 = vmax.f32 %v1518_v53, %v2818_v32  ;;  %v1199_v36 = vadd.f32 %v2329_v17, %v1198_v28  ;;  %v2821_v37 = vpop.f32.mrb[27].mxu0  ;;  %v2199_v39 = vpack.c.bf16 %v2341_v31, %v2339_v27  ;;  %v1142_v13 = vmul.f32 1.442695, %v1141_v7 }
 0x5a2   : > { %v1521_v40 = vmax.f32 %v1517_v57, %v2821_v37  ;;  %v2202_v41 = vpack.c.bf16 %v2343_v34, %v2805_v56 }
 0x5a3   : > { %2191 = vmatpush3.bf16.msra.mxu1 %v2190_v21  ;;  %v1200_v42 = vadd.f32 %v2331_v19, %v1199_v36  ;;  %2344 = vpow2.f32 %v1142_v13 }
 0x5a4   : > { %2192 = vmatprep.subr.bf16.mxu1 %v2481_v38 }
 0x5a5   : > { %v1201_v44 = vadd.f32 %v2333_v22, %v1200_v42 }
 0x5a7   : > { %2194 = vmatpush3.bf16.msra.mxu1 %v2193_v25  ;;  %v1202_v45 = vadd.f32 %v2335_v23, %v1201_v44 }
 0x5a8   : > { %2195 = vmatprep.subr.bf16.mxu1 %v2481_v38  ;;  %v2827_v46 = vpop.f32.mrb[28].mxu0 }
 0x5a9   : > { %v1524_v47 = vmax.f32 %v1520_v10, %v2827_v46  ;;  %v2830_v48 = vpop.f32.mrb[29].mxu0  ;;  %v1203_v49 = vadd.f32 %v2337_v26, %v1202_v45 }
 0x5aa   : > { %v1523_v50 = vmax.f32 %v1519_v18, %v2830_v48 }
 0x5ab   : > { %2197 = vmatpush3.bf16.msra.mxu1 %v2196_v30  ;;  %v1204_v52 = vadd.f32 %v2339_v27, %v1203_v49 }
 0x5ac   : > { %v1527_v53 = vmax.f32 %v1523_v50, %v1524_v47  ;;  %2198 = vmatprep.subr.bf16.mxu1 %v2481_v38 }
 0x5ad   : > { %v1205_v55 = vadd.f32 %v2341_v31, %v1204_v52 }
 0x5af   : > { %2200 = vmatpush3.bf16.msra.mxu1 %v2199_v39  ;;  %v1206_v57 = vadd.f32 %v2805_v56, %v1205_v55 }
 0x5b0   : > { %2201 = vmatprep.subr.bf16.mxu1 %v2481_v38  ;;  %v2836_v58 = vpop.f32.mrb[30].mxu0 }
 0x5b1   : > { %v1526_v59 = vmax.f32 %v1522_v35, %v2836_v58  ;;  %v2839_v60 = vpop.f32.mrb[31].mxu0  ;;  %v1207_v61 = vadd.f32 %v2343_v34, %v1206_v57 }
 0x5b2   : > { %v1525_v62 = vmax.f32 %v1521_v40, %v2839_v60 }
 0x5b3   : > { %2203 = vmatpush3.bf16.msra.mxu1 %v2202_v41  ;;  %v1208_v28 = vrot.slane %v1207_v61, 4  ;;  %v2345_v41 = vpop.eup %2344 }
 0x5b4   : > { %v1528_v0 = vmax.f32 %v1525_v62, %v1526_v59  ;;  %2204 = vmatprep.subr.bf16.mxu1 %v2481_v38 }
 0x5b5   : > { %v1209_v35 = vadd.f32 %v1208_v28, %v1207_v61 }
 0x5b6   : > { %v1529_v1 = vmax.f32 %v1527_v53, %v1528_v0  ;;  %2112 = vmatmul.mubr.f32.vlgmr.msra.gmra.mrb[0].mxu1 %v893_v63 }
 0x5b7   : > { %2172 = vmatprep.mubr.msk.f32.mxu1 %vm2482_vm5, %v2483_v43  ;;  %v1210_v44 = vrot.slane %v1209_v35, 2 }
 0x5b8   : > { %v1530_v56 = vrot.slane %v1529_v1, 4 }
 0x5b9   : > { %v1211_v57 = vadd.f32 %v1210_v44, %v1209_v35 }
 0x5ba   : > { %v1531_v2 = vmax.f32 %v1529_v1, %v1530_v56 }
 0x5bb   : > { %v1212_v1 = vrot.slane %v1211_v57, 1 }
 0x5bc   : > { %v1532_v3 = vrot.slane %v1531_v2, 2 }
 0x5bd   : > { %v1213_v13 = vadd.f32 %v1212_v1, %v1211_v57 }
 0x5be   : > { %v1533_v4 = vmax.f32 %v1531_v2, %v1532_v3 }
 0x5c0   : > { %v1534_v5 = vrot.slane %v1533_v4, 1 }
 0x5c2   : > { %v1535_v10 = vmax.f32 %v1533_v4, %v1534_v5 }
 0x5c4   : > { %v1536_v11 = vmax.f32 %v2768_v16, %v1535_v10 }
 0x5c6   : > { %v1540_v17 = vsub.f32 %v2762_v9, %v1536_v11  ;;  %v1541_v18 = vsub.f32 %v2760_v8, %v1536_v11  ;;  %v1542_v19 = vsub.f32 %v2766_v15, %v1536_v11  ;;  %v1543_v20 = vsub.f32 %v2764_v14, %v1536_v11 }
 0x5c7   : > { %v1544_v43 = vsub.f32 %v2783_v33, %v1536_v11  ;;  %v1545_v21 = vsub.f32 %v2778_v29, %v1536_v11  ;;  %v1546_v22 = vsub.f32 %v2803_v54, %v1536_v11  ;;  %v1547_v23 = vsub.f32 %v2799_v51, %v1536_v11 }
 0x5c8   : > { %v1548_v24 = vsub.f32 %v2813_v12, %v1536_v11  ;;  %v1549_v25 = vsub.f32 %v2810_v6, %v1536_v11  ;;  %v1550_v9 = vsub.f32 %v2821_v37, %v1536_v11  ;;  %v1551_v8 = vsub.f32 %v2818_v32, %v1536_v11 }
 0x5c9   : > { %v1552_v15 = vsub.f32 %v2830_v48, %v1536_v11  ;;  %v1553_v14 = vsub.f32 %v2827_v46, %v1536_v11  ;;  %v1554_v33 = vsub.f32 %v2839_v60, %v1536_v11  ;;  %v1555_v29 = vsub.f32 %v2836_v58, %v1536_v11 }
 0x5ca   : > { %v1556_v26 = vmul.f32 1.442695, %v1540_v17  ;;  %v1558_v54 = vmul.f32 1.442695, %v1541_v18  ;;  %v1560_v27 = vmul.f32 1.442695, %v1542_v19  ;;  %v1537_v40 = vsub.f32 %v2768_v16, %v1536_v11 }
 0x5cb   : > { %v1562_v51 = vmul.f32 1.442695, %v1543_v20  ;;  %v1564_v12 = vmul.f32 1.442695, %v1544_v43  ;;  %v1566_v6 = vmul.f32 1.442695, %v1545_v21 }
 0x5cc   : > { %2346 = vpow2.f32 %v1556_v26  ;;  %v1568_v30 = vmul.f32 1.442695, %v1546_v22  ;;  %v1570_v31 = vmul.f32 1.442695, %v1547_v23  ;;  %v1572_v32 = vmul.f32 1.442695, %v1548_v24 }
 0x5cd   : > { %2348 = vpow2.f32 %v1558_v54  ;;  %v1574_v34 = vmul.f32 1.442695, %v1549_v25  ;;  %v1576_v36 = vmul.f32 1.442695, %v1550_v9  ;;  %v1578_v37 = vmul.f32 1.442695, %v1551_v8 }
 0x5ce   : > { %2350 = vpow2.f32 %v1560_v27  ;;  %v1580_v39 = vmul.f32 1.442695, %v1552_v15  ;;  %v1582_v42 = vmul.f32 1.442695, %v1553_v14  ;;  %v1584_v46 = vmul.f32 1.442695, %v1554_v33 }
 0x5cf   : > { %2352 = vpow2.f32 %v1562_v51  ;;  %v1586_v48 = vmul.f32 1.442695, %v1555_v29  ;;  %v1538_v53 = vmul.f32 1.442695, %v1537_v40  ;;  %v1192_v43 = vmul.f32 0.0, %v2345_v41 }
 0x5d0   : > { %2354 = vpow2.f32 %v1564_v12 }
 0x5d1   : > { %2356 = vpow2.f32 %v1566_v6  ;;  %v1214_v25 = vadd.f32 %v1213_v13, %v1192_v43  ;;  %v1289_v6 = vld [vmem:[#allocation4 + $0x8] sm:$0xff] }
 0x5d2   : > { %2358 = vpow2.f32 %v1568_v30 }
 0x5d3   : > { %2360 = vpow2.f32 %v1570_v31 }
 0x5d4   : > { %2362 = vpow2.f32 %v1572_v32 }
 0x5d5   : > { %2364 = vpow2.f32 %v1574_v34 }
 0x5d6   : > { %v2347_v45 = vpop.eup %2346  ;;  %2366 = vpow2.f32 %v1576_v36 }
 0x5d7   : > { %v2349_v47 = vpop.eup %2348  ;;  %2368 = vpow2.f32 %v1578_v37  ;;  %v1686_v37 = vld [vmem:[%s2953_s8] sm:$0xff] }
 0x5d8   : > { %v2351_v49 = vpop.eup %2350  ;;  %2370 = vpow2.f32 %v1580_v39  ;;  %v1589_v50 = vadd.f32 %v2349_v47, %v2347_v45  ;;  %v2205_v52 = vpack.c.bf16 %v2349_v47, %v2347_v45  ;;  %v2484_v39 = vmov 0  }
 0x5d9   : > { %v2353_v55 = vpop.eup %2352  ;;  %2372 = vpow2.f32 %v1582_v42  ;;  %2310 = vset.pattern.permute.xlu1 %v2484_v39  ;;  %2311 = vset.pattern.permute.xlu0 %v2484_v39 }
 0x5da   : > { %v2355_v58 = vpop.eup %2354  ;;  %2374 = vpow2.f32 %v1584_v46  ;;  %v1590_v16 = vadd.f32 %v2351_v49, %v1589_v50  ;;  %2206 = vmatpush3.bf16.msra.mxu1 %v2205_v52  ;;  %v2208_v59 = vpack.c.bf16 %v2353_v55, %v2351_v49  ;;  %1689 = vperm.xlu1 %2310, %v1686_v37   ;;  %v1685_v49 = vld [vmem:[%s2952_s7] sm:$0xff] }
 0x5db   : > { %v2357_v60 = vpop.eup %2356  ;;  %2376 = vpow2.f32 %v1586_v48  ;;  %2207 = vmatprep.subr.bf16.mxu1 %v2481_v38 }
 0x5dc   : > { %v2359_v61 = vpop.eup %2358  ;;  %v1591_v62 = vadd.f32 %v2353_v55, %v1590_v16  ;;  %v2211_v63 = vpack.c.bf16 %v2357_v60, %v2355_v58  ;;  %2378 = vpow2.f32 %v1538_v53  ;;  %v1767_v53 = vld [vmem:[%s1766_s20] sm:$0xff] }
 0x5dd   : > { %v2361_v0 = vpop.eup %2360 }
 0x5de   : > { %v2363_v56 = vpop.eup %2362  ;;  %v1592_v2 = vadd.f32 %v2355_v58, %v1591_v62  ;;  %2209 = vmatpush3.bf16.msra.mxu1 %v2208_v59  ;;  %v2214_v3 = vpack.c.bf16 %v2361_v0, %v2359_v61 }
 0x5df   : > { %v2365_v4 = vpop.eup %2364  ;;  %2210 = vmatprep.subr.bf16.mxu1 %v2481_v38 }
 0x5e0   : > { %v2367_v5 = vpop.eup %2366  ;;  %v1593_v7 = vadd.f32 %v2357_v60, %v1592_v2  ;;  %v2217_v10 = vpack.c.bf16 %v2365_v4, %v2363_v56 }
 0x5e1   : > { %v2369_v11 = vpop.eup %2368 }
 0x5e2   : > { %v2371_v17 = vpop.eup %2370  ;;  %v1594_v18 = vadd.f32 %v2359_v61, %v1593_v7  ;;  %2212 = vmatpush3.bf16.msra.mxu1 %v2211_v63  ;;  %v2220_v19 = vpack.c.bf16 %v2369_v11, %v2367_v5 }
 0x5e3   : > { %v2373_v20 = vpop.eup %2372  ;;  %2213 = vmatprep.subr.bf16.mxu1 %v2481_v38 }
 0x5e4   : > { %v2375_v21 = vpop.eup %2374  ;;  %v1595_v22 = vadd.f32 %v2361_v0, %v1594_v18  ;;  %v2223_v23 = vpack.c.bf16 %v2373_v20, %v2371_v17 }
 0x5e5   : > { %v2377_v24 = vpop.eup %2376 }
 0x5e6   : > { %v2379_v9 = vpop.eup %2378  ;;  %v1596_v8 = vadd.f32 %v2363_v56, %v1595_v22  ;;  %2215 = vmatpush3.bf16.msra.mxu1 %v2214_v3  ;;  %v2226_v15 = vpack.c.bf16 %v2377_v24, %v2375_v21 }
 0x5e7   : > { %2216 = vmatprep.subr.bf16.mxu1 %v2481_v38  ;;  %v1588_v14 = vmul.f32 %v2379_v9, %v1214_v25 }
 0x5e8   : > { %v1597_v33 = vadd.f32 %v2365_v4, %v1596_v8 }
 0x5ea   : > { %v1598_v29 = vadd.f32 %v2367_v5, %v1597_v33  ;;  %2218 = vmatpush3.bf16.msra.mxu1 %v2217_v10 }
 0x5eb   : > { %2219 = vmatprep.subr.bf16.mxu1 %v2481_v38 }
 0x5ec   : > { %v1599_v26 = vadd.f32 %v2369_v11, %v1598_v29 }
 0x5ee   : > { %v1600_v54 = vadd.f32 %v2371_v17, %v1599_v26  ;;  %2221 = vmatpush3.bf16.msra.mxu1 %v2220_v19 }
 0x5ef   : > { %2222 = vmatprep.subr.bf16.mxu1 %v2481_v38 }
 0x5f0   : > { %v1601_v27 = vadd.f32 %v2373_v20, %v1600_v54 }
 0x5f2   : > { %v1602_v51 = vadd.f32 %v2375_v21, %v1601_v27  ;;  %2224 = vmatpush3.bf16.msra.mxu1 %v2223_v23 }
 0x5f3   : > { %2225 = vmatprep.subr.bf16.mxu1 %v2481_v38 }
 0x5f4   : > { %v1603_v12 = vadd.f32 %v2377_v24, %v1602_v51 }
 0x5f6   : > { %2227 = vmatpush3.bf16.msra.mxu1 %v2226_v15  ;;  %v1604_v28 = vrot.slane %v1603_v12, 4 }
 0x5f8   : > { %v1605_v30 = vadd.f32 %v1604_v28, %v1603_v12 }
 0x5f9   : > { %2173 = vmatmul.mubr.f32.vlgmr.msra.gmra.mrb[2].mxu1 %v1289_v6 }
 0x5fa   : > { %v1606_v31 = vrot.slane %v1605_v30, 2 }
 0x5fc   : > { %v1607_v32 = vadd.f32 %v1606_v31, %v1605_v30 }
 0x5fe   : > { %v1608_v34 = vrot.slane %v1607_v32, 1 }
 0x600   : > { %v1609_v35 = vadd.f32 %v1608_v34, %v1607_v32 }
 0x602   : > { %v1610_v36 = vadd.f32 %v1609_v35, %v1588_v14 }
 0x604   : > { %2380 = vrcp.f32 %v1610_v36 }
 0x60e   : > { %v2381_v47 = vpop.eup %2380 }
 0x659   : > { %v1690_v50 = vpop.permute.xlu1 %1689 }
 0x689   : > { %v1281_v38 = vpop.f32.mrb[0].mxu1 }
 0x68a   : > { %v1285_v40 = vadd.f32 %v1281_v38, %v1192_v43  ;;  %v2113_v41 = vpop.f32.mrb[1].mxu1 }
 0x68c   : > { %v1611_v42 = vmul.f32 %v2379_v9, %v1285_v40 }
 0x6cc   : > { %v1678_v44 = vpop.f32.mrb[2].mxu1 }
 0x6cd   : > { %v1682_v45 = vadd.f32 %v1678_v44, %v1611_v42  ;;  %v2174_v46 = vpop.f32.mrb[3].mxu1 }
 0x6cf   : > { %v1684_v48 = vmul.f32 %v2381_v47, %v1682_v45 }
 0x6d1   : > { %2176 = vmatpush3.msra.mxu0 %v1684_v48 }
 0x6d2   : > { %2178 = vmatmul.mubr.msk.f32.vlgmr.msra.gmra.mrb[32].mxu0 %vm926_vm4, %v1685_v49 }
 0x7a5   : > { %v1761_v52 = vpop.f32.mrb[32].mxu0 }
 0x7a6   : > { %v1762_v55 = vadd.f32 %v1761_v52, %v1690_v50  ;;  %v2179_v57 = vpop.f32.mrb[33].mxu0 }
 0x7a8   : > { %v1768_v58 = vadd.f32 %v1767_v53, %v1762_v55 }
 0x7aa   : > { %1769 = vst [vmem:[%s2969_s13] sm:$0xff] %v1768_v58 }
 0x7ab   : > { %2395 = shalt.err (!%p2392_p7)
}
 0x7ac   : > { %s2396_s29 = scalar_lea.hbm %s2888_s2, 128  ;;  %s2400_s24 = scalar_lea.hbm %s2954_s9, 512 }
 0x7ad   : > { %p2397_p9 = scmp.ne.s32.totalorder %s2888_s2, %s2396_s29  ;;  %p2401_p12 = scmp.lt.u32.totalorder %s2888_s2, %s2954_s9 }
 0x7ae   : > { %p2402_p13 = scmp.lt.u32.totalorder %s2400_s24, %s2396_s29  ;;  %p2404_p1 = scmp.lt.u32.totalorder %s2396_s29, %s2888_s2 }
 0x7af   : > { %p2398_p10 = pnand %p2397_p9, %p2587_p3 }
 0x7b0   : > { %p2403_p0 = por %p2402_p13, %p2401_p12 }
 0x7b1   : > { %p2399_p11 = pneg %p2398_p10 }
 0x7b2   : > { %p2405_p2 = por %p2404_p1, %p2403_p0 }
 0x7b4   : > { %p2406_p4 = pnand %p2405_p2, %p2399_p11 }
 0x7b6   : > { %2409 = shalt.err (!%p2406_p4)
}
 0x7b7   : > { %2228 = dma.vmem_to_hbm [thread:$0]  (%p2587_p3), %s2890_s1, 128, %s2888_s2, %s1771_s21  }
 0x7b8 PF: > { %p2234_p5 = scmp.ge.s32.totalorder %s2476_s16, 2  ;;  %s1798_s13 = sand.u32 1, %s2448_s30  }
 0x7b9   : > { %s1799_s12 = scalar_lea.sflag [#allocation6], %s1798_s13 }
 0x7ba   : > { %p2231_p6 = pnand %p2234_p5, %p2596_p8 }
 0x7bc   : > { %2443 = dma.done.wait (!%p2231_p6), %s1799_s12, 128  }
 0x7bd   : > { %2445 = vsyncadd (!%p2231_p6), %s1799_s12, 4294967168  ;;  %s22_s16 = sadd.s32 1, %s2476_s16   ;;  %s2971_s1 = sld [smem:[#allocation8_spill]] }
 0x7be   : > { %p19_p7 = scmp.ge.s32.totalorder %s22_s16, 6   ;;  %s2972_s2 = sld [smem:[#allocation9_spill]] }
 0x7bf   : > { %s2973_s30 = smov %s2452_s10  ;;  %s2974_s10 = smov %s2456_s11 }
 0x7c0   : > { %s2975_s11 = smov %s2605_s27  ;;  %s2976_s12 = smov %s2468_s14 }
 0x7c1   : > { %s2977_s13 = smov %s2472_s15  ;;  %21 = sbr.rel (!%p19_p7) target bundleno = 9 (0x9), region = 99 }
 0x7c3   : > { %s2978_s14 = smov %s2971_s1 }
 0x7c4   : > { %s2979_s15 = smov %s2972_s2 }
 0x7c8   :  { %1804 = vsyncpa [#allocation6], 1 }
 0x7c9   :  { %1806 = vsyncpa [#allocation6 + $0x1], 1 }

</bundles_post_ra>
